<compile_context>
chip_gen: v7x
topology: tpu7x:2x2x1
jax: 0.10.0
libtpu: 0.0.40
codegen_flags: <defaults>
</compile_context>

<pallas_src>
import jax
import jax.numpy as jnp
from jax import lax
from jax.experimental import pallas as pl
from jax.experimental.pallas import tpu as pltpu

# ----------------------------- hyper-parameters (small) ----------------------
NUM_CLASSES = 4
INPUT_CH    = 8      # EEG electrodes (conv_2 kernel height)
INPUT_TIME  = 32     # "freq" in the torch code (time samples)
BATCH       = 2

FREQ   = INPUT_TIME
KW1    = FREQ // 2          # conv_1 temporal kernel width
PAD1   = FREQ // 4          # conv_1 temporal padding
KH2    = INPUT_CH           # conv_2 spatial (height) kernel
KW3    = FREQ // 4          # conv_3 temporal kernel width
PAD3   = FREQ // 4          # conv_3 temporal padding
C1, C2 = 4, 8               # channel counts after conv_1 / conv_2
BN_EPS = 1e-5

H   = INPUT_CH
W   = INPUT_TIME
HP  = H + 2                       # conv_1 pads height by 1 each side (kh = 1)
W1  = W + 2 * PAD1 - KW1 + 1      # after conv_1                     (33)
H2  = HP - KH2 + 1                # after conv_2                     (3)
W1P = W1 // 4                     # after AvgPool2d((1,4))           (8)
W3  = W1P + 2 * PAD3 - KW3 + 1    # after conv_3 / conv_4            (17)
W3P = W3 // 8                     # after AvgPool2d((1,8))           (2)
N_OUTPUTS = C2 * H2 * W3P         # flattened features -> Linear     (48)

NR  = BATCH * HP                          # valid stacked rows (batch x padded height)
RP  = ((NR + KH2 - 1 + 7) // 8) * 8       # sublane-padded rows so conv_2 shifts stay in-bounds
CW1 = C2 * W1                             # lanes after conv_1 duplication (264)
CW3 = C2 * W3                             # lanes after conv_3 / conv_4    (136)
CWP = C2 * W3P                            # lanes after avgPool_2          (16)


# ----------------------------- Pallas kernel ----------------------------------
def _elu(z):
    # nn.ELU(alpha=1): z if z>0 else exp(z)-1  (exp arg clamped for safety)
    return jnp.where(z > 0, z, jnp.exp(jnp.minimum(z, 0.0)) - 1.0)


def eegnet_kernel(xp_ref, m1_ref, w2_ref, c2_ref, g_ref, gb_ref,
                  p2_ref, wl_ref, bl_ref, out_ref):
    """Whole EEGNet4 forward (convnet + classifier + softmax), whole batch, grid=()."""
    # conv_1 (+BN_1 scale); output channels pre-duplicated per conv_2 output channel
    # on the lane axis -> one lane-dense MXU matmul.
    y1 = jnp.dot(xp_ref[...], m1_ref[...], preferred_element_type=jnp.float32)  # (RP, CW1)

    # conv_2 (full-height grouped conv) + all folded biases + BN_2: a depthwise conv
    # along the sublane (height) axis -> KH2 shift / lane-scale / accumulate steps.
    # Rows b*HP + h2 (h2 < H2) are the valid outputs; remaining rows are dead padding.
    w2 = w2_ref[...]                                                 # (KH2, CW1)
    acc = w2[0:1, :] * y1[0:NR, :]
    for kh in range(1, KH2):
        acc = acc + w2[kh:kh + 1, :] * y1[kh:kh + NR, :]
    z2 = _elu(acc + c2_ref[...])                                     # (NR, CW1)

    # avgPool_1 + conv_3 (depthwise) + conv_4 (1x1 mix) + BN_3, all linear, folded
    # host-side into one block matrix + lane bias vector -> one matmul, then ELU.
    z3 = _elu(jnp.dot(z2, g_ref[...], preferred_element_type=jnp.float32)
              + gb_ref[...])                                         # (NR, CW3)

    # avgPool_2 as a block-diagonal pooling matrix.
    f = jnp.dot(z3, p2_ref[...], preferred_element_type=jnp.float32)  # (NR, CWP)

    # Linear classifier + softmax(dim=1), fused (per-sample, per-height partial dots).
    wl = wl_ref[...]                                                 # (H2*CWP, NUM_CLASSES)
    bl = bl_ref[...]                                                 # (1, NUM_CLASSES)
    for b in range(BATCH):
        lg = bl
        for h2 in range(H2):
            lg = lg + jnp.dot(f[b * HP + h2: b * HP + h2 + 1, :],
                              wl[h2 * CWP:(h2 + 1) * CWP, :],
                              preferred_element_type=jnp.float32)
        m = jnp.max(lg, axis=1, keepdims=True)
        e = jnp.exp(lg - m)
        out_ref[b:b + 1, :] = e / jnp.sum(e, axis=1, keepdims=True)


def eegnet_forward(xp, m1d, w2s, cbias2, g, gb, p2blk, wlt, bl2):
    args = (xp, m1d, w2s, cbias2, g, gb, p2blk, wlt, bl2)
    return pl.pallas_call(
        eegnet_kernel,
        out_shape=jax.ShapeDtypeStruct((BATCH, NUM_CLASSES), jnp.float32),
        in_specs=[pl.BlockSpec(memory_space=pltpu.MemorySpace.VMEM)] * len(args),
        out_specs=pl.BlockSpec(memory_space=pltpu.MemorySpace.VMEM),
    )(*args)


# ----------------------------- host-side folding helpers (plain JAX) ----------
def toeplitz_1d(kernels, in_len, out_len, pad):
    """T[c, i, w] = kernels[c, i - w + pad] (cross-correlation with zero padding)."""
    K = kernels.shape[1]
    i = jnp.arange(in_len)[:, None]
    w = jnp.arange(out_len)[None, :]
    t = i - w + pad
    valid = (t >= 0) & (t < K)
    tc = jnp.clip(t, 0, K - 1)
    gathered = kernels[:, tc]                      # (C, in_len, out_len)
    return jnp.where(valid[None, :, :], gathered, 0.0).astype(jnp.float32)


def avgpool_matrix(in_len, k):
    out_len = in_len // k
    i = jnp.arange(in_len)[:, None]
    j = jnp.arange(out_len)[None, :]
    m = ((i // k) == j) & (i < out_len * k)
    return m.astype(jnp.float32) / float(k)


def bn_affine(gamma, beta, mean, var, eps=BN_EPS):
    s = gamma / jnp.sqrt(var + eps)
    return s, beta - mean * s


def prepare_operands(x, p):
    """Fold BN / biases into the dense matmul operands (one-time, host-side)."""
    bn1s, bn1b = bn_affine(p['g1'], p['be1'], p['rm1'], p['rv1'])
    bn2s, bn2b = bn_affine(p['g2'], p['be2'], p['rm2'], p['rv2'])
    bn3s, bn3b = bn_affine(p['g3'], p['be3'], p['rm3'], p['rv3'])
    gmap = jnp.arange(C2) // (C2 // C1)            # conv_2 group of each output channel

    # conv_1 Toeplitz, BN_1 scale folded, duplicated per conv_2 output channel (lanes).
    M1 = toeplitz_1d(p['w1'][:, 0, 0, :], W, W1, PAD1) * bn1s[:, None, None]   # (C1,W,W1)
    M1D = jnp.transpose(M1[gmap], (1, 0, 2)).reshape(W, CW1)                   # (W, CW1)

    # conv_2 height taps (+BN_2 scale) broadcast over lanes; all constant terms
    # (BN_1 bias through conv_2, conv_2 bias, BN_2 bias) fold into one lane vector.
    w2k = p['w2'][:, 0, :, 0]                                                  # (C2, KH2)
    W2S = jnp.repeat((w2k * bn2s[:, None]).T, W1, axis=1)                      # (KH2, CW1)
    cb2 = bn2s * (p['b2'] + bn1b[gmap] * jnp.sum(w2k, axis=1)) + bn2b
    CB2 = jnp.repeat(cb2, W1)[None, :]                                         # (1, CW1)

    # avgPool_1 -> conv_3 (depthwise Toeplitz) -> conv_4 (1x1 mix) -> BN_3 scale:
    # all linear, folded into one (CW1, CW3) block matrix + one lane bias vector.
    P1 = avgpool_matrix(W1, 4)                                                 # (W1, W1P)
    M3 = toeplitz_1d(p['w3'][:, 0, 0, :], W1P, W3, PAD3)                       # (C2,W1P,W3)
    A  = jnp.einsum('iw,cwj->cij', P1, M3)                                     # (C2, W1, W3)
    w4m = p['w4'][:, :, 0, 0]                                                  # (oc, ic)
    coef = (w4m * bn3s[:, None]).T                                             # (ic, oc)
    G  = jnp.einsum('cij,cd->cidj', A, coef).reshape(CW1, CW3)                 # (CW1, CW3)
    gb = bn3s * (w4m @ p['b3'] + p['b4']) + bn3b
    GB = jnp.repeat(gb, W3)[None, :]                                           # (1, CW3)

    # avgPool_2 as a block-diagonal pooling matrix.
    P2blk = jnp.kron(jnp.eye(C2, dtype=jnp.float32), avgpool_matrix(W3, 8))    # (CW3, CWP)

    # classifier weights permuted from torch's (oc, h2, w3p) flatten order to the
    # kernel's (h2, oc, w3p) row layout; bias as a (1, NUM_CLASSES) row.
    wl_r = p['wl'].T.reshape(C2, H2, W3P, NUM_CLASSES)
    WLT = jnp.transpose(wl_r, (1, 0, 2, 3)).reshape(H2 * CWP, NUM_CLASSES)
    BL = p['bl'][None, :]

    # input: drop the singleton channel, zero-pad height by 1 (conv_1 padding),
    # stack batch on sublanes, pad rows so conv_2's shifted reads stay in bounds.
    xp = jnp.pad(x[:, 0], ((0, 0), (1, 1), (0, 0))).reshape(NR, W)
    xp = jnp.pad(xp, ((0, RP - NR), (0, 0)))
    return xp, M1D, W2S, CB2, G, GB, P2blk, WLT, BL


# ----------------------------- pure-JAX reference ------------------------------
def reference_forward(x, p):
    dn = ('NCHW', 'OIHW', 'NCHW')

    def bn(y, g, b, m, v):
        return (y - m[None, :, None, None]) / jnp.sqrt(v[None, :, None, None] + BN_EPS) \
            * g[None, :, None, None] + b[None, :, None, None]

    y = lax.conv_general_dilated(x, p['w1'], (1, 1), [(1, 1), (PAD1, PAD1)],
                                 dimension_numbers=dn)
    y = bn(y, p['g1'], p['be1'], p['rm1'], p['rv1'])
    y = lax.conv_general_dilated(y, p['w2'], (1, 1), [(0, 0), (0, 0)],
                                 dimension_numbers=dn, feature_group_count=C1)
    y = y + p['b2'][None, :, None, None]
    y = bn(y, p['g2'], p['be2'], p['rm2'], p['rv2'])
    y = jax.nn.elu(y)
    wc = (y.shape[3] // 4) * 4
    y = y[..., :wc].reshape(y.shape[0], y.shape[1], y.shape[2], wc // 4, 4).mean(-1)
    y = lax.conv_general_dilated(y, p['w3'], (1, 1), [(0, 0), (PAD3, PAD3)],
                                 dimension_numbers=dn, feature_group_count=C2)
    y = y + p['b3'][None, :, None, None]
    y = lax.conv_general_dilated(y, p['w4'], (1, 1), [(0, 0), (0, 0)],
                                 dimension_numbers=dn)
    y = y + p['b4'][None, :, None, None]
    y = bn(y, p['g3'], p['be3'], p['rm3'], p['rv3'])
    y = jax.nn.elu(y)
    wc = (y.shape[3] // 8) * 8
    y = y[..., :wc].reshape(y.shape[0], y.shape[1], y.shape[2], wc // 8, 8).mean(-1)
    flat = y.reshape(y.shape[0], -1)
    logits = flat @ p['wl'].T + p['bl']
    return jax.nn.softmax(logits, axis=1)


# ----------------------------- main --------------------------------------------
if __name__ == "__main__":
    key = jax.random.PRNGKey(0)
    ks = jax.random.split(key, 24)

    def nrm(k, shape, scale=0.3):
        return scale * jax.random.normal(k, shape, dtype=jnp.float32)

    params = dict(
        w1=nrm(ks[0], (C1, 1, 1, KW1)),
        g1=1.0 + nrm(ks[1], (C1,), 0.1), be1=nrm(ks[2], (C1,), 0.1),
        rm1=nrm(ks[3], (C1,), 0.1),
        rv1=0.5 + jax.random.uniform(ks[4], (C1,), dtype=jnp.float32),
        w2=nrm(ks[5], (C2, 1, KH2, 1)), b2=nrm(ks[6], (C2,), 0.1),
        g2=1.0 + nrm(ks[7], (C2,), 0.1), be2=nrm(ks[8], (C2,), 0.1),
        rm2=nrm(ks[9], (C2,), 0.1),
        rv2=0.5 + jax.random.uniform(ks[10], (C2,), dtype=jnp.float32),
        w3=nrm(ks[11], (C2, 1, 1, KW3)), b3=nrm(ks[12], (C2,), 0.1),
        w4=nrm(ks[13], (C2, C2, 1, 1)), b4=nrm(ks[14], (C2,), 0.1),
        g3=1.0 + nrm(ks[15], (C2,), 0.1), be3=nrm(ks[16], (C2,), 0.1),
        rm3=nrm(ks[17], (C2,), 0.1),
        rv3=0.5 + jax.random.uniform(ks[18], (C2,), dtype=jnp.float32),
        wl=nrm(ks[19], (NUM_CLASSES, N_OUTPUTS)), bl=nrm(ks[20], (NUM_CLASSES,), 0.1),
    )
    x = jax.random.normal(ks[21], (BATCH, 1, H, W), dtype=jnp.float32)

    # ---- host-side folding of BN / biases into matmul operands (one-time)
    operands = prepare_operands(x, params)

    # ---- run the single fused Pallas kernel (convnet + classifier + softmax)
    probs = eegnet_forward(*operands)
    probs = jax.block_until_ready(probs)

    # ---- verify against a pure-JAX reference of the torch forward pass
    ref = jax.block_until_ready(reference_forward(x, params))
    assert probs.shape == (BATCH, NUM_CLASSES)
    max_err = float(jnp.max(jnp.abs(probs - ref)))
    row_sums = jnp.sum(probs, axis=1)
    assert max_err < 1e-4, f"mismatch vs reference: {max_err}"
    assert float(jnp.max(jnp.abs(row_sums - 1.0))) < 1e-5

    print("KERNEL_OK")
</pallas_src>

<mosaic_0001>
module attributes {stable_mosaic.version = 11 : i64} {
  func.func @eegnet_kernel(%arg0: memref<32x32xf32, #tpu.memory_space<vmem>>, %arg1: memref<32x264xf32, #tpu.memory_space<vmem>>, %arg2: memref<8x264xf32, #tpu.memory_space<vmem>>, %arg3: memref<1x264xf32, #tpu.memory_space<vmem>>, %arg4: memref<264x136xf32, #tpu.memory_space<vmem>>, %arg5: memref<1x136xf32, #tpu.memory_space<vmem>>, %arg6: memref<136x16xf32, #tpu.memory_space<vmem>>, %arg7: memref<48x4xf32, #tpu.memory_space<vmem>>, %arg8: memref<1x4xf32, #tpu.memory_space<vmem>>, %arg9: memref<2x4xf32, #tpu.memory_space<vmem>>) attributes {dimension_semantics = [], scalar_prefetch = 0 : i64, scratch_operands = 0 : i64, tpu.core_type = #tpu.core_type<tc>} {
    %c0 = arith.constant 0 : index
    %c0_0 = arith.constant 0 : index
    %0 = vector.load %arg0[%c0, %c0_0] : memref<32x32xf32, #tpu.memory_space<vmem>>, vector<32x32xf32>
    %c0_1 = arith.constant 0 : index
    %c0_2 = arith.constant 0 : index
    %1 = vector.load %arg1[%c0_1, %c0_2] : memref<32x264xf32, #tpu.memory_space<vmem>>, vector<32x264xf32>
    %cst = arith.constant dense<0.000000e+00> : vector<32x264xf32>
    %2 = tpu.matmul %0, %1, %cst {dimension_numbers = #tpu.dot_dimension_numbers<[1], [0], [0], [1], [0, 0, 1, 1], [], []>} : vector<32x32xf32>, vector<32x264xf32>, vector<32x264xf32> -> vector<32x264xf32>
    %c0_3 = arith.constant 0 : index
    %c0_4 = arith.constant 0 : index
    %3 = vector.load %arg2[%c0_3, %c0_4] : memref<8x264xf32, #tpu.memory_space<vmem>>, vector<8x264xf32>
    %4 = vector.extract_strided_slice %3 {offsets = [0, 0], sizes = [1, 264], strides = [1, 1]} : vector<8x264xf32> to vector<1x264xf32>
    %5 = vector.extract_strided_slice %2 {offsets = [0, 0], sizes = [20, 264], strides = [1, 1]} : vector<32x264xf32> to vector<20x264xf32>
    %6 = vector.broadcast %4 : vector<1x264xf32> to vector<20x264xf32>
    %7 = arith.mulf %6, %5 : vector<20x264xf32>
    %8 = vector.extract_strided_slice %3 {offsets = [1, 0], sizes = [1, 264], strides = [1, 1]} : vector<8x264xf32> to vector<1x264xf32>
    %9 = vector.extract_strided_slice %2 {offsets = [1, 0], sizes = [20, 264], strides = [1, 1]} : vector<32x264xf32> to vector<20x264xf32>
    %10 = vector.broadcast %8 : vector<1x264xf32> to vector<20x264xf32>
    %11 = arith.mulf %10, %9 : vector<20x264xf32>
    %12 = arith.addf %7, %11 : vector<20x264xf32>
    %13 = vector.extract_strided_slice %3 {offsets = [2, 0], sizes = [1, 264], strides = [1, 1]} : vector<8x264xf32> to vector<1x264xf32>
    %14 = vector.extract_strided_slice %2 {offsets = [2, 0], sizes = [20, 264], strides = [1, 1]} : vector<32x264xf32> to vector<20x264xf32>
    %15 = vector.broadcast %13 : vector<1x264xf32> to vector<20x264xf32>
    %16 = arith.mulf %15, %14 : vector<20x264xf32>
    %17 = arith.addf %12, %16 : vector<20x264xf32>
    %18 = vector.extract_strided_slice %3 {offsets = [3, 0], sizes = [1, 264], strides = [1, 1]} : vector<8x264xf32> to vector<1x264xf32>
    %19 = vector.extract_strided_slice %2 {offsets = [3, 0], sizes = [20, 264], strides = [1, 1]} : vector<32x264xf32> to vector<20x264xf32>
    %20 = vector.broadcast %18 : vector<1x264xf32> to vector<20x264xf32>
    %21 = arith.mulf %20, %19 : vector<20x264xf32>
    %22 = arith.addf %17, %21 : vector<20x264xf32>
    %23 = vector.extract_strided_slice %3 {offsets = [4, 0], sizes = [1, 264], strides = [1, 1]} : vector<8x264xf32> to vector<1x264xf32>
    %24 = vector.extract_strided_slice %2 {offsets = [4, 0], sizes = [20, 264], strides = [1, 1]} : vector<32x264xf32> to vector<20x264xf32>
    %25 = vector.broadcast %23 : vector<1x264xf32> to vector<20x264xf32>
    %26 = arith.mulf %25, %24 : vector<20x264xf32>
    %27 = arith.addf %22, %26 : vector<20x264xf32>
    %28 = vector.extract_strided_slice %3 {offsets = [5, 0], sizes = [1, 264], strides = [1, 1]} : vector<8x264xf32> to vector<1x264xf32>
    %29 = vector.extract_strided_slice %2 {offsets = [5, 0], sizes = [20, 264], strides = [1, 1]} : vector<32x264xf32> to vector<20x264xf32>
    %30 = vector.broadcast %28 : vector<1x264xf32> to vector<20x264xf32>
    %31 = arith.mulf %30, %29 : vector<20x264xf32>
    %32 = arith.addf %27, %31 : vector<20x264xf32>
    %33 = vector.extract_strided_slice %3 {offsets = [6, 0], sizes = [1, 264], strides = [1, 1]} : vector<8x264xf32> to vector<1x264xf32>
    %34 = vector.extract_strided_slice %2 {offsets = [6, 0], sizes = [20, 264], strides = [1, 1]} : vector<32x264xf32> to vector<20x264xf32>
    %35 = vector.broadcast %33 : vector<1x264xf32> to vector<20x264xf32>
    %36 = arith.mulf %35, %34 : vector<20x264xf32>
    %37 = arith.addf %32, %36 : vector<20x264xf32>
    %38 = vector.extract_strided_slice %3 {offsets = [7, 0], sizes = [1, 264], strides = [1, 1]} : vector<8x264xf32> to vector<1x264xf32>
    %39 = vector.extract_strided_slice %2 {offsets = [7, 0], sizes = [20, 264], strides = [1, 1]} : vector<32x264xf32> to vector<20x264xf32>
    %40 = vector.broadcast %38 : vector<1x264xf32> to vector<20x264xf32>
    %41 = arith.mulf %40, %39 : vector<20x264xf32>
    %42 = arith.addf %37, %41 : vector<20x264xf32>
    %c0_5 = arith.constant 0 : index
    %c0_6 = arith.constant 0 : index
    %43 = vector.load %arg3[%c0_5, %c0_6] : memref<1x264xf32, #tpu.memory_space<vmem>>, vector<1x264xf32>
    %44 = vector.broadcast %43 : vector<1x264xf32> to vector<20x264xf32>
    %45 = arith.addf %42, %44 : vector<20x264xf32>
    %cst_7 = arith.constant 0.000000e+00 : f32
    %46 = vector.broadcast %cst_7 : f32 to vector<20x264xf32>
    %47 = arith.cmpf ogt, %45, %46 : vector<20x264xf32>
    %cst_8 = arith.constant 0.000000e+00 : f32
    %48 = vector.broadcast %cst_8 : f32 to vector<20x264xf32>
    %49 = arith.minimumf %45, %48 : vector<20x264xf32>
    %50 = math.exp %49 : vector<20x264xf32>
    %cst_9 = arith.constant 1.000000e+00 : f32
    %51 = vector.broadcast %cst_9 : f32 to vector<20x264xf32>
    %52 = arith.subf %50, %51 : vector<20x264xf32>
    %53 = arith.select %47, %45, %52 : vector<20x264xi1>, vector<20x264xf32>
    %c0_10 = arith.constant 0 : index
    %c0_11 = arith.constant 0 : index
    %54 = vector.load %arg4[%c0_10, %c0_11] : memref<264x136xf32, #tpu.memory_space<vmem>>, vector<264x136xf32>
    %cst_12 = arith.constant dense<0.000000e+00> : vector<20x136xf32>
    %55 = tpu.matmul %53, %54, %cst_12 {dimension_numbers = #tpu.dot_dimension_numbers<[1], [0], [0], [1], [0, 0, 1, 1], [], []>} : vector<20x264xf32>, vector<264x136xf32>, vector<20x136xf32> -> vector<20x136xf32>
    %c0_13 = arith.constant 0 : index
    %c0_14 = arith.constant 0 : index
    %56 = vector.load %arg5[%c0_13, %c0_14] : memref<1x136xf32, #tpu.memory_space<vmem>>, vector<1x136xf32>
    %57 = vector.broadcast %56 : vector<1x136xf32> to vector<20x136xf32>
    %58 = arith.addf %55, %57 : vector<20x136xf32>
    %cst_15 = arith.constant 0.000000e+00 : f32
    %59 = vector.broadcast %cst_15 : f32 to vector<20x136xf32>
    %60 = arith.cmpf ogt, %58, %59 : vector<20x136xf32>
    %cst_16 = arith.constant 0.000000e+00 : f32
    %61 = vector.broadcast %cst_16 : f32 to vector<20x136xf32>
    %62 = arith.minimumf %58, %61 : vector<20x136xf32>
    %63 = math.exp %62 : vector<20x136xf32>
    %cst_17 = arith.constant 1.000000e+00 : f32
    %64 = vector.broadcast %cst_17 : f32 to vector<20x136xf32>
    %65 = arith.subf %63, %64 : vector<20x136xf32>
    %66 = arith.select %60, %58, %65 : vector<20x136xi1>, vector<20x136xf32>
    %c0_18 = arith.constant 0 : index
    %c0_19 = arith.constant 0 : index
    %67 = vector.load %arg6[%c0_18, %c0_19] : memref<136x16xf32, #tpu.memory_space<vmem>>, vector<136x16xf32>
    %cst_20 = arith.constant dense<0.000000e+00> : vector<20x16xf32>
    %68 = tpu.matmul %66, %67, %cst_20 {dimension_numbers = #tpu.dot_dimension_numbers<[1], [0], [0], [1], [0, 0, 1, 1], [], []>} : vector<20x136xf32>, vector<136x16xf32>, vector<20x16xf32> -> vector<20x16xf32>
    %c0_21 = arith.constant 0 : index
    %c0_22 = arith.constant 0 : index
    %69 = vector.load %arg7[%c0_21, %c0_22] : memref<48x4xf32, #tpu.memory_space<vmem>>, vector<48x4xf32>
    %c0_23 = arith.constant 0 : index
    %c0_24 = arith.constant 0 : index
    %70 = vector.load %arg8[%c0_23, %c0_24] : memref<1x4xf32, #tpu.memory_space<vmem>>, vector<1x4xf32>
    %71 = vector.extract_strided_slice %68 {offsets = [0, 0], sizes = [1, 16], strides = [1, 1]} : vector<20x16xf32> to vector<1x16xf32>
    %72 = vector.extract_strided_slice %69 {offsets = [0, 0], sizes = [16, 4], strides = [1, 1]} : vector<48x4xf32> to vector<16x4xf32>
    %cst_25 = arith.constant dense<0.000000e+00> : vector<1x4xf32>
    %73 = tpu.matmul %71, %72, %cst_25 {dimension_numbers = #tpu.dot_dimension_numbers<[1], [0], [0], [1], [0, 0, 1, 1], [], []>} : vector<1x16xf32>, vector<16x4xf32>, vector<1x4xf32> -> vector<1x4xf32>
    %74 = arith.addf %70, %73 : vector<1x4xf32>
    %75 = vector.extract_strided_slice %68 {offsets = [1, 0], sizes = [1, 16], strides = [1, 1]} : vector<20x16xf32> to vector<1x16xf32>
    %76 = vector.extract_strided_slice %69 {offsets = [16, 0], sizes = [16, 4], strides = [1, 1]} : vector<48x4xf32> to vector<16x4xf32>
    %cst_26 = arith.constant dense<0.000000e+00> : vector<1x4xf32>
    %77 = tpu.matmul %75, %76, %cst_26 {dimension_numbers = #tpu.dot_dimension_numbers<[1], [0], [0], [1], [0, 0, 1, 1], [], []>} : vector<1x16xf32>, vector<16x4xf32>, vector<1x4xf32> -> vector<1x4xf32>
    %78 = arith.addf %74, %77 : vector<1x4xf32>
    %79 = vector.extract_strided_slice %68 {offsets = [2, 0], sizes = [1, 16], strides = [1, 1]} : vector<20x16xf32> to vector<1x16xf32>
    %80 = vector.extract_strided_slice %69 {offsets = [32, 0], sizes = [16, 4], strides = [1, 1]} : vector<48x4xf32> to vector<16x4xf32>
    %cst_27 = arith.constant dense<0.000000e+00> : vector<1x4xf32>
    %81 = tpu.matmul %79, %80, %cst_27 {dimension_numbers = #tpu.dot_dimension_numbers<[1], [0], [0], [1], [0, 0, 1, 1], [], []>} : vector<1x16xf32>, vector<16x4xf32>, vector<1x4xf32> -> vector<1x4xf32>
    %82 = arith.addf %78, %81 : vector<1x4xf32>
    %cst_28 = arith.constant dense<0xFF800000> : vector<1xf32>
    %83 = vector.multi_reduction <maximumf>, %82, %cst_28 [1] : vector<1x4xf32> to vector<1xf32>
    %84 = vector.shape_cast %83 : vector<1xf32> to vector<1x1xf32>
    %85 = vector.broadcast %84 : vector<1x1xf32> to vector<1x4xf32>
    %86 = arith.subf %82, %85 : vector<1x4xf32>
    %87 = math.exp %86 : vector<1x4xf32>
    %cst_29 = arith.constant dense<0.000000e+00> : vector<1xf32>
    %88 = vector.multi_reduction <add>, %87, %cst_29 [1] : vector<1x4xf32> to vector<1xf32>
    %89 = vector.shape_cast %88 : vector<1xf32> to vector<1x1xf32>
    %90 = vector.broadcast %89 : vector<1x1xf32> to vector<1x4xf32>
    %91 = arith.divf %87, %90 : vector<1x4xf32>
    %c0_30 = arith.constant 0 : index
    %c0_31 = arith.constant 0 : index
    %92 = vector.load %arg9[%c0_30, %c0_31] : memref<2x4xf32, #tpu.memory_space<vmem>>, vector<1x4xf32>
    tpu.vector_store %arg9[%c0_30, %c0_31], %91 {strides = array<i32>} : memref<2x4xf32, #tpu.memory_space<vmem>>, vector<1x4xf32>,
    %93 = vector.extract_strided_slice %68 {offsets = [10, 0], sizes = [1, 16], strides = [1, 1]} : vector<20x16xf32> to vector<1x16xf32>
    %94 = vector.extract_strided_slice %69 {offsets = [0, 0], sizes = [16, 4], strides = [1, 1]} : vector<48x4xf32> to vector<16x4xf32>
    %cst_32 = arith.constant dense<0.000000e+00> : vector<1x4xf32>
    %95 = tpu.matmul %93, %94, %cst_32 {dimension_numbers = #tpu.dot_dimension_numbers<[1], [0], [0], [1], [0, 0, 1, 1], [], []>} : vector<1x16xf32>, vector<16x4xf32>, vector<1x4xf32> -> vector<1x4xf32>
    %96 = arith.addf %70, %95 : vector<1x4xf32>
    %97 = vector.extract_strided_slice %68 {offsets = [11, 0], sizes = [1, 16], strides = [1, 1]} : vector<20x16xf32> to vector<1x16xf32>
    %98 = vector.extract_strided_slice %69 {offsets = [16, 0], sizes = [16, 4], strides = [1, 1]} : vector<48x4xf32> to vector<16x4xf32>
    %cst_33 = arith.constant dense<0.000000e+00> : vector<1x4xf32>
    %99 = tpu.matmul %97, %98, %cst_33 {dimension_numbers = #tpu.dot_dimension_numbers<[1], [0], [0], [1], [0, 0, 1, 1], [], []>} : vector<1x16xf32>, vector<16x4xf32>, vector<1x4xf32> -> vector<1x4xf32>
    %100 = arith.addf %96, %99 : vector<1x4xf32>
    %101 = vector.extract_strided_slice %68 {offsets = [12, 0], sizes = [1, 16], strides = [1, 1]} : vector<20x16xf32> to vector<1x16xf32>
    %102 = vector.extract_strided_slice %69 {offsets = [32, 0], sizes = [16, 4], strides = [1, 1]} : vector<48x4xf32> to vector<16x4xf32>
    %cst_34 = arith.constant dense<0.000000e+00> : vector<1x4xf32>
    %103 = tpu.matmul %101, %102, %cst_34 {dimension_numbers = #tpu.dot_dimension_numbers<[1], [0], [0], [1], [0, 0, 1, 1], [], []>} : vector<1x16xf32>, vector<16x4xf32>, vector<1x4xf32> -> vector<1x4xf32>
    %104 = arith.addf %100, %103 : vector<1x4xf32>
    %cst_35 = arith.constant dense<0xFF800000> : vector<1xf32>
    %105 = vector.multi_reduction <maximumf>, %104, %cst_35 [1] : vector<1x4xf32> to vector<1xf32>
    %106 = vector.shape_cast %105 : vector<1xf32> to vector<1x1xf32>
    %107 = vector.broadcast %106 : vector<1x1xf32> to vector<1x4xf32>
    %108 = arith.subf %104, %107 : vector<1x4xf32>
    %109 = math.exp %108 : vector<1x4xf32>
    %cst_36 = arith.constant dense<0.000000e+00> : vector<1xf32>
    %110 = vector.multi_reduction <add>, %109, %cst_36 [1] : vector<1x4xf32> to vector<1xf32>
    %111 = vector.shape_cast %110 : vector<1xf32> to vector<1x1xf32>
    %112 = vector.broadcast %111 : vector<1x1xf32> to vector<1x4xf32>
    %113 = arith.divf %109, %112 : vector<1x4xf32>
    %c1 = arith.constant 1 : index
    %c0_37 = arith.constant 0 : index
    %114 = vector.load %arg9[%c1, %c0_37] : memref<2x4xf32, #tpu.memory_space<vmem>>, vector<1x4xf32>
    tpu.vector_store %arg9[%c1, %c0_37], %113 {strides = array<i32>} : memref<2x4xf32, #tpu.memory_space<vmem>>, vector<1x4xf32>,
    return
  }
}

</mosaic_0001>

<bundles_post_ra>
// kernel: tpu_custom_call.1
= control target key start
LH: loop header
LB: loop body
LE: loop exit
PB: predicated region body
PF: predicated region fallthrough
CT: control target
= control target key end

     0   :  { %v3216_v7 = vmov 0.0   ;;  %vm49_vm0 = vcmask 261120   ;;  %s3204_s0 = inlined_call_operand.vmem [shape: f32[32,32], index: 0, kind: input, shape index: {}]   ;;  %s3205_s1 = inlined_call_operand.vmem [shape: f32[32,264], index: 1, kind: input, shape index: {}]   ;;  %s3206_s2 = inlined_call_operand.vmem [shape: f32[8,264], index: 2, kind: input, shape index: {}]   ;;  %s3207_s3 = inlined_call_operand.vmem [shape: f32[1,264], index: 3, kind: input, shape index: {}]   ;;  %s3208_s4 = inlined_call_operand.vmem [shape: f32[264,136], index: 4, kind: input, shape index: {}]   ;;  %s3209_s5 = inlined_call_operand.vmem [shape: f32[1,136], index: 5, kind: input, shape index: {}]   ;;  %s3210_s6 = inlined_call_operand.vmem [shape: f32[136,16], index: 6, kind: input, shape index: {}]   ;;  %s3211_s7 = inlined_call_operand.vmem [shape: f32[48,4], index: 7, kind: input, shape index: {}]   ;;  %s3212_s8 = inlined_call_operand.vmem [shape: f32[1,4], index: 8, kind: input, shape index: {}]   ;;  %s3213_s9 = inlined_call_operand.hbm [shape: f32[2,4], index: 9, kind: output, shape index: {}]  }
   0x1   :  { %v38_v0 = vld [vmem:[%s3205_s1 + $0x8] sm:$0xff]  ;;  %v41_v1 = vld [vmem:[%s3205_s1 + $0x20] sm:$0xff]  ;;  %v39_v2 = vld [vmem:[%s3205_s1 + $0x10] sm:$0xff]  ;;  %126 = vmatprep.mubr.f32.mxu0 %v3216_v7 }
   0x2   :  { %v1828_v3 = vpack.c.bf16 %v41_v1, %v38_v0  ;;  %v42_v4 = vld [vmem:[%s3205_s1 + $0x28] sm:$0xff]  ;;  %v37_v5 = vld [vmem:[%s3205_s1] sm:$0xff]  ;;  %v40_v6 = vld [vmem:[%s3205_s1 + $0x18] sm:$0xff] }
   0x3   :  { %v1836_v8 = vpack.c.bf16 %v42_v4, %v39_v2  ;;  %v1830_v9 = vpack.c.bf16 %v40_v6, %v37_v5  ;;  %v44_v10 = vld [vmem:[%s3205_s1 + $0x38] sm:$0xff]  ;;  %v47_v11 = vld [vmem:[%s3205_s1 + $0x50] sm:$0xff]  ;;  %v45_v12 = vld [vmem:[%s3205_s1 + $0x40] sm:$0xff] }
   0x4   :  { %1829 = vmatprep.subr.bf16.mxu0 %v1828_v3  ;;  %v1832_v13 = vpack.c.bf16 %v47_v11, %v44_v10  ;;  %v48_v14 = vld [vmem:[%s3205_s1 + $0x58] sm:$0xff]  ;;  %v43_v15 = vld [vmem:[%s3205_s1 + $0x30] sm:$0xff]  ;;  %v46_v16 = vld [vmem:[%s3205_s1 + $0x48] sm:$0xff] }
   0x5   :  { %1837 = vmatprep.subr.bf16.mxu1 %v1836_v8  ;;  %1831 = vmatpush1.bf16.msra.mxu0 %v1830_v9  ;;  %v1840_v17 = vpack.c.bf16 %v48_v14, %v45_v12  ;;  %v1834_v18 = vpack.c.bf16 %v46_v16, %v43_v15  ;;  %v33_v19 = vld [vmem:[%s3204_s0] sm:$0xff]  ;;  %v825_v20 = vld [vmem:[%s3208_s4 + $0x8] sm:$0xff]  ;;  %v827_v21 = vld [vmem:[%s3208_s4 + $0x18] sm:$0xff] }
   0x6   :  { %1839 = vmatpush3.bf16.msra.mxu1 %v1836_v8  ;;  %1833 = vmatprep.subr.bf16.mxu0 %v1832_v13  ;;  %v1844_v22 = vpack.c.bf16 %v827_v21, %v825_v20  ;;  %v824_v23 = vld [vmem:[%s3208_s4] sm:$0xff]  ;;  %v826_v24 = vld [vmem:[%s3208_s4 + $0x10] sm:$0xff]  ;;  %v829_v25 = vld [vmem:[%s3208_s4 + $0x28] sm:$0xff] }
   0x7   :  { %1841 = vmatprep.subr.bf16.mxu1 %v1840_v17  ;;  %1780 = vmatprep.mubr.msk.f32.mxu1 %vm49_vm0, %v33_v19  ;;  %v831_v26 = vld [vmem:[%s3208_s4 + $0x38] sm:$0xff]  ;;  %v34_v27 = vld [vmem:[%s3204_s0 + $0x8] sm:$0xff]  ;;  %v1846_v28 = vpack.c.bf16 %v826_v24, %v824_v23  ;;  %v35_v29 = vld [vmem:[%s3204_s0 + $0x10] sm:$0xff] }
   0x8   :  { %v1848_v30 = vpack.c.bf16 %v831_v26, %v829_v25  ;;  %v828_v31 = vld [vmem:[%s3208_s4 + $0x20] sm:$0xff]  ;;  %v830_v32 = vld [vmem:[%s3208_s4 + $0x30] sm:$0xff]  ;;  %v833_v33 = vld [vmem:[%s3208_s4 + $0x48] sm:$0xff] }
   0x9   :  { %1835 = vmatpush1.bf16.msra.mxu0 %v1834_v18  ;;  %v835_v34 = vld [vmem:[%s3208_s4 + $0x58] sm:$0xff] }
   0xa   :  { %1843 = vmatpush3.bf16.msra.mxu1 %v1840_v17  ;;  %1845 = vmatprep.subr.bf16.mxu0 %v1844_v22 }
   0xc   :  { %1711 = vmatmul.mubr.msk.f32.vlgmr.msra.gmra.mrb[0].mxu0 %vm49_vm0, %v33_v19 }
   0xd   :  { %1781 = vmatmul.mubr.msk.f32.vlgmr.msra.gmra.mrb[0].mxu1 %vm49_vm0, %v34_v27  ;;  %132 = vmatprep.mubr.f32.mxu0 %v3216_v7 }
   0xe   :  { %14 = vsyncpa [#allocation3], 0  ;;  %1783 = vmatprep.mubr.msk.f32.mxu1 %vm49_vm0, %v35_v29  ;;  %v36_v35 = vld [vmem:[%s3204_s0 + $0x18] sm:$0xff]  ;;  %1847 = vmatpush1.bf16.msra.mxu0 %v1846_v28  ;;  %v1850_v36 = vpack.c.bf16 %v830_v32, %v828_v31  ;;  %v1852_v37 = vpack.c.bf16 %v835_v34, %v833_v33  ;;  %v832_v38 = vld [vmem:[%s3208_s4 + $0x40] sm:$0xff]  ;;  %vm290_vm1 = vcmask 1046528   ;;  %vm354_vm2 = vcmask 1045504  }
   0xf   :  { %1849 = vmatprep.subr.bf16.mxu0 %v1848_v30  ;;  %v834_v39 = vld [vmem:[%s3208_s4 + $0x50] sm:$0xff]  ;;  %v837_v40 = vld [vmem:[%s3208_s4 + $0x68] sm:$0xff]  ;;  %v839_v41 = vld [vmem:[%s3208_s4 + $0x78] sm:$0xff]  ;;  %vm552_vm3 = vcmask 1042432   ;;  %vm628_vm4 = vcmask 1041408   ;;  %vm704_vm5 = vcmask 1040384  }
  0x10   :  { %1712 = vmatmul.mubr.msk.f32.gmra.mrb[2].mxu0 %vm49_vm0, %v34_v27  ;;  %v1854_v42 = vpack.c.bf16 %v834_v39, %v832_v38  ;;  %v1856_v43 = vpack.c.bf16 %v839_v41, %v837_v40  ;;  %v836_v44 = vld [vmem:[%s3208_s4 + $0x60] sm:$0xff]  ;;  %v838_v45 = vld [vmem:[%s3208_s4 + $0x70] sm:$0xff]  ;;  %v841_v46 = vld [vmem:[%s3208_s4 + $0x88] sm:$0xff]  ;;  %vm418_vm6 = vcmask 1044480   ;;  %vm482_vm7 = vcmask 1043456  }
  0x11   :  { %1784 = vmatmul.mubr.msk.f32.gmra.mrb[2].mxu1 %vm49_vm0, %v36_v35  ;;  %138 = vmatprep.mubr.f32.mxu0 %v3216_v7  ;;  %v843_v47 = vld [vmem:[%s3208_s4 + $0x98] sm:$0xff]  ;;  %v1858_v48 = vpack.c.bf16 %v838_v45, %v836_v44  ;;  %v840_v50 = vld [vmem:[%s3208_s4 + $0x80] sm:$0xff]  ;;  %v842_v51 = vld [vmem:[%s3208_s4 + $0x90] sm:$0xff]  ;;  %vm902_vm8 = vcmask 64512  }
  0x12   :  { %1851 = vmatpush1.bf16.msra.mxu0 %v1850_v36  ;;  %1059 = vmatprep.mubr.f32.mxu1 %v3216_v7  ;;  %v1860_v49 = vpack.c.bf16 %v843_v47, %v841_v46  ;;  %v1862_v52 = vpack.c.bf16 %v842_v51, %v840_v50  ;;  %v845_v53 = vld [vmem:[%s3208_s4 + $0xa8] sm:$0xff]  ;;  %v847_v54 = vld [vmem:[%s3208_s4 + $0xb8] sm:$0xff]  ;;  %v844_v56 = vld [vmem:[%s3208_s4 + $0xa0] sm:$0xff] }
  0x13   :  { %1853 = vmatprep.subr.bf16.mxu0 %v1852_v37  ;;  %v1864_v55 = vpack.c.bf16 %v847_v54, %v845_v53  ;;  %v846_v57 = vld [vmem:[%s3208_s4 + $0xb0] sm:$0xff]  ;;  %v849_v59 = vld [vmem:[%s3208_s4 + $0xc8] sm:$0xff]  ;;  %v851_v60 = vld [vmem:[%s3208_s4 + $0xd8] sm:$0xff] }
  0x14   :  { %1713 = vmatmul.mubr.msk.f32.gmra.mrb[4].mxu0 %vm49_vm0, %v35_v29  ;;  %v1866_v58 = vpack.c.bf16 %v846_v57, %v844_v56  ;;  %v1868_v61 = vpack.c.bf16 %v851_v60, %v849_v59  ;;  %v848_v62 = vld [vmem:[%s3208_s4 + $0xc0] sm:$0xff]  ;;  %v850_v63 = vld [vmem:[%s3208_s4 + $0xd0] sm:$0xff]  ;;  %v853_v1 = vld [vmem:[%s3208_s4 + $0xe8] sm:$0xff]  ;;  %v239_v59 = vlaneseq }
  0x15   :  { %144 = vmatprep.mubr.f32.mxu0 %v3216_v7  ;;  %v1870_v0 = vpack.c.bf16 %v850_v63, %v848_v62  ;;  %v855_v2 = vld [vmem:[%s3208_s4 + $0xf8] sm:$0xff]  ;;  %v852_v4 = vld [vmem:[%s3208_s4 + $0xe0] sm:$0xff]  ;;  %v854_v5 = vld [vmem:[%s3208_s4 + $0xf0] sm:$0xff] }
  0x16   :  { %1855 = vmatpush1.bf16.msra.mxu0 %v1854_v42  ;;  %v1872_v3 = vpack.c.bf16 %v855_v2, %v853_v1  ;;  %v1874_v6 = vpack.c.bf16 %v854_v5, %v852_v4  ;;  %v857_v8 = vld [vmem:[%s3208_s4 + $0x108] sm:$0xff]  ;;  %v859_v9 = vld [vmem:[%s3208_s4 + $0x118] sm:$0xff]  ;;  %v856_v11 = vld [vmem:[%s3208_s4 + $0x100] sm:$0xff]  ;;  %v240_v60 = vshrl.u32 %v239_v59, 7 }
  0x17   :  { %1857 = vmatprep.subr.bf16.mxu0 %v1856_v43  ;;  %v1876_v10 = vpack.c.bf16 %v859_v9, %v857_v8  ;;  %v858_v12 = vld [vmem:[%s3208_s4 + $0x110] sm:$0xff]  ;;  %v861_v14 = vld [vmem:[%s3208_s4 + $0x128] sm:$0xff]  ;;  %v863_v15 = vld [vmem:[%s3208_s4 + $0x138] sm:$0xff] }
  0x18   :  { %1714 = vmatmul.mubr.msk.f32.gmra.mrb[6].mxu0 %vm49_vm0, %v36_v35  ;;  %v1878_v13 = vpack.c.bf16 %v858_v12, %v856_v11  ;;  %v1880_v16 = vpack.c.bf16 %v863_v15, %v861_v14  ;;  %v860_v17 = vld [vmem:[%s3208_s4 + $0x120] sm:$0xff]  ;;  %v862_v18 = vld [vmem:[%s3208_s4 + $0x130] sm:$0xff]  ;;  %v865_v20 = vld [vmem:[%s3208_s4 + $0x148] sm:$0xff]  ;;  %v2357_v63 = vsub.s32 1, %v240_v60  ;;  %v390_v1 = vsub.s32 3, %v240_v60 }
  0x19   :  { %v1882_v19 = vpack.c.bf16 %v862_v18, %v860_v17  ;;  %v867_v21 = vld [vmem:[%s3208_s4 + $0x158] sm:$0xff]  ;;  %v864_v22 = vld [vmem:[%s3208_s4 + $0x140] sm:$0xff]  ;;  %v866_v24 = vld [vmem:[%s3208_s4 + $0x150] sm:$0xff]  ;;  %v454_v5 = vsub.s32 4, %v240_v60  ;;  %v670_v14 = vsub.s32 7, %v240_v60 }
  0x1a   :  { %1859 = vmatpush1.bf16.msra.mxu0 %v1858_v48  ;;  %v1884_v23 = vpack.c.bf16 %v867_v21, %v865_v20  ;;  %v869_v25 = vld [vmem:[%s3208_s4 + $0x168] sm:$0xff]  ;;  %v871_v26 = vld [vmem:[%s3208_s4 + $0x178] sm:$0xff]  ;;  %v1886_v27 = vpack.c.bf16 %v866_v24, %v864_v22  ;;  %v868_v29 = vld [vmem:[%s3208_s4 + $0x160] sm:$0xff]  ;;  %3254 = vst [vmem:[#allocation6_spill] sm:$0xff] %v2357_v63 }
  0x1b   :  { %1861 = vmatprep.subr.bf16.mxu0 %v1860_v49  ;;  %v1888_v28 = vpack.c.bf16 %v871_v26, %v869_v25  ;;  %v870_v30 = vld [vmem:[%s3208_s4 + $0x170] sm:$0xff]  ;;  %v873_v31 = vld [vmem:[%s3208_s4 + $0x188] sm:$0xff]  ;;  %v875_v32 = vld [vmem:[%s3208_s4 + $0x198] sm:$0xff] }
  0x1c   :  { %v1890_v33 = vpack.c.bf16 %v870_v30, %v868_v29  ;;  %v889_v34 = vld [vmem:[%s3208_s4 + $0x208] sm:$0xff]  ;;  %v1892_v35 = vpack.c.bf16 %v875_v32, %v873_v31  ;;  %v872_v36 = vld [vmem:[%s3208_s4 + $0x180] sm:$0xff]  ;;  %v874_v37 = vld [vmem:[%s3208_s4 + $0x190] sm:$0xff] }
  0x1d   :  { %995 = vmatprep.subr.mxu1 %v889_v34  ;;  %v888_v38 = vld [vmem:[%s3208_s4 + $0x200] sm:$0xff]  ;;  %v877_v39 = vld [vmem:[%s3208_s4 + $0x1a8] sm:$0xff]  ;;  %v879_v40 = vld [vmem:[%s3208_s4 + $0x1b8] sm:$0xff]  ;;  %v1894_v41 = vpack.c.bf16 %v874_v37, %v872_v36 }
  0x1e   :  { %1863 = vmatpush1.bf16.msra.mxu0 %v1862_v52  ;;  %996 = vmatpush1.msra.mxu1 %v888_v38  ;;  %v1896_v42 = vpack.c.bf16 %v879_v40, %v877_v39  ;;  %v876_v43 = vld [vmem:[%s3208_s4 + $0x1a0] sm:$0xff]  ;;  %v878_v44 = vld [vmem:[%s3208_s4 + $0x1b0] sm:$0xff]  ;;  %v881_v45 = vld [vmem:[%s3208_s4 + $0x1c8] sm:$0xff] }
  0x1f   :  { %1865 = vmatprep.subr.bf16.mxu0 %v1864_v55  ;;  %v883_v46 = vld [vmem:[%s3208_s4 + $0x1d8] sm:$0xff]  ;;  %v1898_v47 = vpack.c.bf16 %v878_v44, %v876_v43  ;;  %v880_v49 = vld [vmem:[%s3208_s4 + $0x1c0] sm:$0xff]  ;;  %v882_v50 = vld [vmem:[%s3208_s4 + $0x1d0] sm:$0xff] }
  0x20   :  { %v1900_v48 = vpack.c.bf16 %v883_v46, %v881_v45  ;;  %v1902_v51 = vpack.c.bf16 %v882_v50, %v880_v49  ;;  %v885_v52 = vld [vmem:[%s3208_s4 + $0x1e8] sm:$0xff]  ;;  %v887_v53 = vld [vmem:[%s3208_s4 + $0x1f8] sm:$0xff]  ;;  %v884_v55 = vld [vmem:[%s3208_s4 + $0x1e0] sm:$0xff] }
  0x21   :  { %v1904_v54 = vpack.c.bf16 %v887_v53, %v885_v52  ;;  %v886_v56 = vld [vmem:[%s3208_s4 + $0x1f0] sm:$0xff]  ;;  %v236_v62 = vld [vmem:[%s3206_s2] sm:$0xff] }
  0x22   :  { %1867 = vmatpush1.bf16.msra.mxu0 %v1866_v58  ;;  %v1906_v57 = vpack.c.bf16 %v886_v56, %v884_v55  ;;  %v3214_v58 = vmov 0.0|0.0   ;;  %v238_v2 = vld [vmem:[%s3206_s2 + $0x10] sm:$0xff]  ;;  %v2373_v9 = vrot.slane %v236_v62, %v390_v1  ;;  %v2406_v26 = vrot.slane %v236_v62, %v454_v5  ;;  %v2421_v32 = vld [vmem:[%s3210_s6] sm:$0xff] }
  0x23   :  { %1869 = vmatprep.subr.bf16.mxu0 %v1868_v61  ;;  %1908 = vmatprep.subr.bf16.mxu1 %v3214_v58  ;;  %v2352_v61 = vsub.s32 0, %v240_v60  ;;  %v2376_v11 = vrot.slane %v238_v2, %v2357_v63  ;;  %v2393_v20 = vrot.slane %v238_v2, %v454_v5  ;;  %v2404_v25 = vrot.slane %v238_v2, %v670_v14 }
  0x24   :  { %v2412_v29 = vrot.slane %v236_v62, %v670_v14  ;;  %3257 = vst [vmem:[#allocation9_spill] sm:$0xff] %v2421_v32 }
  0x25   :  { %3253 = vst [vmem:[#allocation5_spill] sm:$0xff] %v2352_v61  ;;  %v2366_v4 = vrot.slane %v236_v62, %v2352_v61  ;;  %v2382_v15 = vrot.slane %v238_v2, %v2352_v61  ;;  %3256 = vst [vmem:[#allocation8_spill] sm:$0xff] %v2404_v25 }
  0x26   :  { %1871 = vmatpush1.bf16.msra.mxu0 %v1870_v0  ;;  %v326_v0 = vsub.s32 2, %v240_v60 }
  0x27   :  { %1873 = vmatprep.subr.bf16.mxu0 %v1872_v3  ;;  %v237_v3 = vld [vmem:[%s3206_s2 + $0x8] sm:$0xff] }
  0x28   :  { %v2371_v8 = vrot.slane %v236_v62, %v326_v0  ;;  %v2379_v12 = vrot.slane %v237_v3, %v2352_v61  ;;  %v2387_v17 = vrot.slane %v237_v3, %v2357_v63  ;;  %v2389_v18 = vrot.slane %v237_v3, %v326_v0 }
  0x29   :  { %v2395_v21 = vrot.slane %v237_v3, %v390_v1  ;;  %v2414_v30 = vrot.slane %v237_v3, %v454_v5  ;;  %v2432_v36 = vrot.slane %v237_v3, %v670_v14 }
  0x2a   :  { %1875 = vmatpush1.bf16.msra.mxu0 %v1874_v6  ;;  %v2369_v6 = vrot.slane %v236_v62, %v2357_v63 }
  0x2b   :  { %1877 = vmatprep.subr.bf16.mxu0 %v1876_v10  ;;  %v518_v10 = vsub.s32 5, %v240_v60 }
  0x2d   :  { %v2397_v22 = vrot.slane %v238_v2, %v518_v10  ;;  %v2416_v31 = vrot.slane %v237_v3, %v518_v10 }
  0x2e   :  { %1879 = vmatpush1.bf16.msra.mxu0 %v1878_v13  ;;  %v594_v13 = vsub.s32 6, %v240_v60 }
  0x2f   :  { %1881 = vmatprep.subr.bf16.mxu0 %v1880_v16  ;;  %v2384_v16 = vrot.slane %v238_v2, %v326_v0 }
  0x30   :  { %v2402_v24 = vrot.slane %v238_v2, %v594_v13 }
  0x32   :  { %1883 = vmatpush1.bf16.msra.mxu0 %v1882_v19  ;;  %v2391_v19 = vrot.slane %v238_v2, %v390_v1  ;;  %3255 = vst [vmem:[#allocation7_spill] sm:$0xff] %v2402_v24 }
  0x33   :  { %1885 = vmatprep.subr.bf16.mxu0 %v1884_v23  ;;  %v744_v23 = vld [vmem:[%s3207_s3] sm:$0x7] }
  0x34   :  { %v2434_v37 = vrot.slane %v744_v23, %v326_v0  ;;  %v2437_v38 = vrot.slane %v744_v23, %v2357_v63  ;;  %v2454_v44 = vrot.slane %v744_v23, %v2352_v61 }
  0x36   :  { %1887 = vmatpush1.bf16.msra.mxu0 %v1886_v27  ;;  %v2408_v27 = vrot.slane %v236_v62, %v518_v10  ;;  %3260 = vst [vmem:[#allocation12_spill] sm:$0xff] %v2437_v38  ;;  %3263 = vst [vmem:[#allocation15_spill] sm:$0xff] %v2454_v44 }
  0x37   :  { %1889 = vmatprep.subr.bf16.mxu0 %v1888_v28  ;;  %v2410_v28 = vrot.slane %v236_v62, %v594_v13 }
  0x3a   :  { %1891 = vmatpush1.bf16.msra.mxu0 %v1890_v33  ;;  %v2426_v33 = vld [vmem:[%s3210_s6 + $0x8] sm:$0xff] }
  0x3b   :  { %1893 = vmatprep.subr.bf16.mxu0 %v1892_v35  ;;  %3258 = vst [vmem:[#allocation10_spill] sm:$0xff] %v2426_v33  ;;  %v2430_v35 = vrot.slane %v237_v3, %v594_v13 }
  0x3e   :  { %1895 = vmatpush1.bf16.msra.mxu0 %v1894_v41 }
  0x3f   :  { %1897 = vmatprep.subr.bf16.mxu0 %v1896_v42 }
  0x42   :  { %1899 = vmatpush1.bf16.msra.mxu0 %v1898_v47 }
  0x43   :  { %1901 = vmatprep.subr.bf16.mxu0 %v1900_v48 }
  0x46   :  { %1903 = vmatpush1.bf16.msra.mxu0 %v1902_v51 }
  0x47   :  { %1905 = vmatprep.subr.bf16.mxu0 %v1904_v54 }
  0x4a   :  { %1907 = vmatpush1.bf16.msra.mxu0 %v1906_v57 }
  0xdf   :  { %v2428_v34 = vpop.f32.mrb[0].mxu0 }
  0xe0   :  { %3259 = vst [vmem:[#allocation11_spill] sm:$0xff] %v2428_v34  ;;  %v272_v39 = vmul.f32 %v2369_v6, %v2428_v34  ;;  %v2443_v40 = vmul.f32 %v2371_v8, %v2428_v34  ;;  %v2447_v41 = vmul.f32 %v2373_v9, %v2428_v34  ;;  %v2449_v42 = vpop.f32.mrb[0].mxu1  ;;  %v2451_v43 = vpop.f32.mrb[1].mxu0  ;;  %v2472_v50 = vmul.f32 %v2366_v4, %v2428_v34 }
  0xe1   :  { %v2458_v45 = vmul.f32 %v2449_v42, %v2376_v11  ;;  %v2462_v46 = vmul.f32 %v2449_v42, %v2384_v16  ;;  %v2466_v47 = vmul.f32 %v2449_v42, %v2391_v19  ;;  %v217_v48 = vpop.f32.mrb[1].mxu1  ;;  %v2476_v52 = vmul.f32 %v2449_v42, %v2382_v15 }
  0xe2   :  { %3261 = vst [vmem:[#allocation13_spill] sm:$0xff] %v2443_v40  ;;  %3262 = vst [vmem:[#allocation14_spill] sm:$0xff] %v2447_v41  ;;  %v291_v51 = vrot.slane %v272_v39, 1  ;;  %v2480_v53 = vmul.f32 %v2449_v42, %v2393_v20  ;;  %v2491_v62 = vmul.f32 %v2387_v17, %v2451_v43  ;;  %v2495_v0 = vmul.f32 %v2389_v18, %v2451_v43 }
  0xe3   :  { %3264 = vst [vmem:[#allocation16_spill] sm:$0xff] %v2472_v50  ;;  %v2486_v59 = vpop.f32.mrb[2].mxu0  ;;  %v2499_v1 = vmul.f32 %v2395_v21, %v2451_v43  ;;  %v2505_v5 = vmul.f32 %v2379_v12, %v2451_v43  ;;  %v274_v10 = vmul.f32 %v2376_v11, %v217_v48  ;;  %v338_v13 = vmul.f32 %v2384_v16, %v217_v48 }
  0xe4   :  { %v1785_v2 = vpop.f32.mrb[2].mxu1  ;;  %v2501_v3 = vpop.f32.mrb[3].mxu0  ;;  %v2510_v14 = vmul.f32 %v2391_v19, %v217_v48  ;;  %v253_v49 = vmul.f32 %v2382_v15, %v217_v48  ;;  %v2518_v7 = vmul.f32 %v2393_v20, %v217_v48  ;;  %v2527_v39 = vmul.f32 %v2369_v6, %v2486_v59 }
  0xe5   :  { %v2512_v23 = vpop.f32.mrb[3].mxu1  ;;  %v297_v60 = vrot.slane %v274_v10, 1  ;;  %v361_v57 = vrot.slane %v338_v13, 2  ;;  %v2531_v58 = vmul.f32 %v2371_v8, %v2486_v59  ;;  %v2535_v61 = vmul.f32 %v2373_v9, %v2486_v59 }
  0xe6   :  { %3265 = vst [vmem:[#allocation17_spill] sm:$0xff] %v2512_v23  ;;  %3266 = vst [vmem:[#allocation18_spill] sm:$0xff] %v2527_v39  ;;  %v3269_v10 = vrot.slane %v2458_v45, 1  ;;  %v3270_v54 = vrot.slane %v2462_v46, 2  ;;  %v2546_v32 = vmul.f32 %v2397_v22, %v217_v48  ;;  %v2550_v33 = vmul.f32 %v2449_v42, %v2397_v22 }
  0xe7   :  { %v2522_v56 = vpop.f32.mrb[4].mxu0  ;;  %3267 = vst [vmem:[#allocation19_spill] sm:$0xff] %v2531_v58  ;;  %3268 = vst [vmem:[#allocation20_spill] sm:$0xff] %v2535_v61  ;;  %v2555_v38 = vmul.f32 %v2366_v4, %v2486_v59  ;;  %v2564_v40 = vmul.f32 %v2402_v24, %v217_v48  ;;  %v2597_v58 = vmul.f32 %v1785_v2, %v2404_v25 }
  0xe8   :  { %v2537_v55 = vpop.f32.mrb[5].mxu0  ;;  %v299_v13 = vsel %vm290_vm1, %v297_v60, %v3269_v10  ;;  %v363_v63 = vsel %vm354_vm2, %v361_v57, %v3270_v54  ;;  %v3228_v60 = vrot.slane %v2527_v39, 1  ;;  %v2561_v57 = vmul.f32 %v1785_v2, %v2397_v22 }
  0xe9   :  { %v317_v44 = vadd.f32 %v299_v13, %v253_v49  ;;  %3271 = vst [vmem:[#allocation21_spill] sm:$0xff] %v2555_v38  ;;  %v2577_v10 = vmul.f32 %v2449_v42, %v2402_v24  ;;  %v2580_v54 = vmul.f32 %v1785_v2, %v2402_v24  ;;  %3275 = vst [vmem:[#allocation25_spill] sm:$0xff] %v2597_v58 }
  0xea   :  { %3272 = vst [vmem:[#allocation22_spill] sm:$0xff] %v2561_v57  ;;  %v2573_v13 = vsel %vm290_vm1, %v291_v51, %v3228_v60  ;;  %v2602_v61 = vmul.f32 %v2379_v12, %v2501_v3  ;;  %v2616_v2 = vmul.f32 %v2395_v21, %v2501_v3  ;;  %v2620_v38 = vmul.f32 %v2376_v11, %v2512_v23 }
  0xeb   :  { %v2566_v50 = vpop.f32.mrb[6].mxu0  ;;  %v2568_v49 = vadd.f32 %v363_v63, %v317_v44  ;;  %3273 = vst [vmem:[#allocation23_spill] sm:$0xff] %v2573_v13  ;;  %3274 = vst [vmem:[#allocation24_spill] sm:$0xff] %v2580_v54  ;;  %v2587_v63 = vmul.f32 %v2404_v25, %v217_v48  ;;  %v2591_v44 = vmul.f32 %v2449_v42, %v2404_v25 }
  0xec   :  { %v2582_v41 = vpop.f32.mrb[7].mxu0  ;;  %3276 = vst [vmem:[#allocation26_spill] sm:$0xff] %v2602_v61  ;;  %v2606_v48 = vmul.f32 %v2387_v17, %v2501_v3  ;;  %v2610_v42 = vmul.f32 %v2389_v18, %v2501_v3  ;;  %v2625_v54 = vmul.f32 %v2382_v15, %v2512_v23  ;;  %v2629_v57 = vmul.f32 %v2384_v16, %v2512_v23 }
  0xed   :  { %v2633_v51 = vmul.f32 %v2391_v19, %v2512_v23  ;;  %v2640_v39 = vmul.f32 %v2393_v20, %v2512_v23  ;;  %v2646_v16 = vmul.f32 %v2397_v22, %v2512_v23  ;;  %v2650_v19 = vmul.f32 %v2369_v6, %v2522_v56 }
  0xee   :  { %3277 = vst [vmem:[#allocation27_spill] sm:$0xff] %v2625_v54  ;;  %v2655_v11 = vmul.f32 %v2387_v17, %v2537_v55  ;;  %v257_v20 = vmul.f32 %v2366_v4, %v2522_v56  ;;  %v2661_v58 = vmul.f32 %v2371_v8, %v2522_v56  ;;  %v2666_v6 = vmul.f32 %v2373_v9, %v2522_v56 }
  0xef   :  { %3278 = vst [vmem:[#allocation28_spill] sm:$0xff] %v2650_v19  ;;  %v3239_v22 = vrot.slane %v2650_v19, 1  ;;  %v2670_v61 = vmul.f32 %v2406_v26, %v2428_v34  ;;  %v2674_v17 = vmul.f32 %v2406_v26, %v2486_v59  ;;  %v2679_v8 = vmul.f32 %v2406_v26, %v2522_v56 }
  0xf0   :  { %3279 = vst [vmem:[#allocation29_spill] sm:$0xff] %v2661_v58  ;;  %3280 = vst [vmem:[#allocation30_spill] sm:$0xff] %v2666_v6  ;;  %v2683_v15 = vmul.f32 %v2408_v27, %v2428_v34  ;;  %v2687_v9 = vmul.f32 %v2408_v27, %v2486_v59  ;;  %v3241_v54 = vrot.slane %v2661_v58, 2  ;;  %v2698_v24 = vmul.f32 %v2408_v27, %v2522_v56 }
  0xf1   :  { %v321_v60 = vadd.f32 %v3239_v22, %v257_v20  ;;  %v537_v23 = vmul.f32 %v2408_v27, %v2566_v50  ;;  %v2708_v13 = vmul.f32 %v2410_v28, %v2428_v34  ;;  %v2713_v19 = vmul.f32 %v2410_v28, %v2522_v56 }
  0xf2   :  { %3281 = vst [vmem:[#allocation31_spill] sm:$0xff] %v2683_v15  ;;  %v3248_v26 = vrot.slane %v2698_v24, 5  ;;  %v613_v27 = vmul.f32 %v2410_v28, %v2566_v50  ;;  %v2721_v22 = vmul.f32 %v2412_v29, %v2522_v56  ;;  %v689_v4 = vmul.f32 %v2412_v29, %v2566_v50 }
  0xf3   :  { %v385_v20 = vadd.f32 %v3241_v54, %v321_v60  ;;  %3282 = vst [vmem:[#allocation32_spill] sm:$0xff] %v2708_v13  ;;  %v568_v25 = vrot.slane %v537_v23, 5  ;;  %3283 = vst [vmem:[#allocation33_spill] sm:$0xff] %v2713_v19  ;;  %v3284_v60 = vrot.slane %v2666_v6, 3  ;;  %v258_v23 = vmul.f32 %v2379_v12, %v2537_v55 }
  0xf4   :  { %3285 = vst [vmem:[#allocation34_spill] sm:$0xff] %v2721_v22  ;;  %v3246_v34 = vrot.slane %v2713_v19, 6  ;;  %v644_v13 = vrot.slane %v613_v27, 6  ;;  %v3249_v6 = vrot.slane %v2655_v11, 1  ;;  %v3247_v56 = vrot.slane %v2721_v22, 7 }
  0xf5   :  { %v449_v54 = vadd.f32 %v3284_v60, %v385_v20  ;;  %v569_v58 = vsel %vm552_vm3, %v3248_v26, %v568_v25  ;;  %v3286_v20 = vrot.slane %v2679_v8, 4  ;;  %v720_v15 = vrot.slane %v689_v4, 7 }
  0xf6   :  { %v2737_v50 = vmul.f32 %v2389_v18, %v2537_v55  ;;  %v645_v12 = vsel %vm628_vm4, %v3246_v34, %v644_v13  ;;  %v322_v25 = vadd.f32 %v3249_v6, %v258_v23  ;;  %v2746_v27 = vmul.f32 %v2395_v21, %v2537_v55 }
  0xf7   :  { %v513_v60 = vadd.f32 %v3286_v20, %v449_v54  ;;  %v2750_v54 = vmul.f32 %v2414_v30, %v2537_v55  ;;  %v2755_v18 = vsel %vm704_vm5, %v3247_v56, %v720_v15  ;;  %v2760_v13 = vmul.f32 %v2416_v31, %v2537_v55 }
  0xf8   :  { %3287 = vst [vmem:[#allocation35_spill] sm:$0xff] %v2755_v18  ;;  %v3250_v20 = vrot.slane %v2737_v50, 2  ;;  %v538_v34 = vmul.f32 %v2416_v31, %v2582_v41  ;;  %v614_v26 = vmul.f32 %v2430_v35, %v2582_v41  ;;  %v2780_v23 = vmul.f32 %v2432_v36, %v2537_v55 }
  0xf9   :  { %v589_v4 = vadd.f32 %v569_v58, %v513_v60  ;;  %v2768_v58 = vmul.f32 %v2430_v35, %v2537_v55  ;;  %v690_v18 = vmul.f32 %v2432_v36, %v2582_v41  ;;  %v3293_v21 = vrot.slane %v2518_v7, 4 }
  0xfa   :  { %v386_v15 = vadd.f32 %v3250_v20, %v322_v25  ;;  %v570_v6 = vrot.slane %v538_v34, 5  ;;  %v3290_v25 = vrot.slane %v2466_v47, 3  ;;  %v3291_v20 = vrot.slane %v2510_v14, 3 }
  0xfb   :  { %v2770_v60 = vadd.f32 %v645_v12, %v589_v4  ;;  %v3289_v12 = vrot.slane %v2746_v27, 3  ;;  %v3292_v34 = vrot.slane %v2480_v53, 4  ;;  %v3294_v22 = vrot.slane %v2760_v13, 5 }
  0xfc   :  { %v427_v56 = vsel %vm418_vm6, %v3291_v20, %v3290_v25  ;;  %v716_v19 = vrot.slane %v2780_v23, 7  ;;  %v3296_v20 = vrot.slane %v2768_v58, 6  ;;  %v3297_v7 = vrot.slane %v2550_v33, 5 }
  0xfd   :  { %3288 = vst [vmem:[#allocation36_spill] sm:$0xff] %v2770_v60  ;;  %v450_v4 = vadd.f32 %v3289_v12, %v386_v15  ;;  %v646_v60 = vrot.slane %v614_v26, 6  ;;  %v491_v55 = vsel %vm482_vm7, %v3293_v21, %v3292_v34  ;;  %v571_v41 = vsel %vm552_vm3, %v3294_v22, %v570_v6 }
  0xfe   :  { %v722_v15 = vrot.slane %v690_v18, 7  ;;  %v445_v26 = vadd.f32 %v427_v56, %v2568_v49  ;;  %v3295_v12 = vrot.slane %v2750_v54, 4  ;;  %v3298_v21 = vrot.slane %v2546_v32, 5 }
  0xff   :  { %v647_v25 = vsel %vm628_vm4, %v3296_v20, %v646_v60  ;;  %v3299_v22 = vrot.slane %v2577_v10, 6  ;;  %v3300_v6 = vrot.slane %v2564_v40, 6  ;;  %v3301_v60 = vrot.slane %v2591_v44, 7 }
 0x100   :  { %v514_v14 = vadd.f32 %v3295_v12, %v450_v4  ;;  %v561_v34 = vsel %vm552_vm3, %v3298_v21, %v3297_v7  ;;  %v2819_v49 = vsel %vm704_vm5, %v716_v19, %v722_v15  ;;  %v509_v56 = vadd.f32 %v491_v55, %v445_v26 }
 0x101   :  { %v637_v18 = vsel %vm628_vm4, %v3300_v6, %v3299_v22  ;;  %v3302_v4 = vrot.slane %v2587_v63, 7  ;;  %v3303_v12 = vrot.slane %v2606_v48, 1  ;;  %v3304_v20 = vrot.slane %v2491_v62, 1 }
 0x102   :  { %v590_v7 = vadd.f32 %v571_v41, %v514_v14  ;;  %v3305_v22 = vrot.slane %v2610_v42, 2  ;;  %v3306_v15 = vrot.slane %v2495_v0, 2  ;;  %v3307_v26 = vrot.slane %v2616_v2, 3 }
 0x103   :  { %v713_v32 = vsel %vm704_vm5, %v3302_v4, %v3301_v60  ;;  %v296_v40 = vsel %vm290_vm1, %v3304_v20, %v3303_v12  ;;  %v3308_v63 = vrot.slane %v2499_v1, 3  ;;  %v585_v60 = vadd.f32 %v561_v34, %v509_v56 }
 0x104   :  { %v316_v21 = vadd.f32 %v296_v40, %v2505_v5  ;;  %v360_v55 = vsel %vm354_vm2, %v3306_v15, %v3305_v22  ;;  %v465_v62 = vmul.f32 %v2414_v30, %v2451_v43  ;;  %v2846_v41 = vmul.f32 %v2414_v30, %v2501_v3 }
 0x105   :  { %v424_v6 = vsel %vm418_vm6, %v3308_v63, %v3307_v26  ;;  %v529_v5 = vmul.f32 %v2416_v31, %v2451_v43  ;;  %v2850_v0 = vadd.f32 %v647_v25, %v590_v7  ;;  %v2854_v4 = vmul.f32 %v2416_v31, %v2501_v3 }
 0x106   :  { %v380_v14 = vadd.f32 %v360_v55, %v316_v21  ;;  %v605_v1 = vmul.f32 %v2430_v35, %v2451_v43  ;;  %v661_v34 = vadd.f32 %v637_v18, %v585_v60  ;;  %v486_v56 = vrot.slane %v465_v62, 4 }
 0x107   :  { %v487_v12 = vrot.slane %v2846_v41, 4  ;;  %v556_v20 = vrot.slane %v529_v5, 5  ;;  %v557_v40 = vrot.slane %v2854_v4, 5  ;;  %v2862_v25 = vmul.f32 %v2430_v35, %v2501_v3 }
 0x108   :  { %v444_v30 = vadd.f32 %v424_v6, %v380_v14  ;;  %v632_v7 = vrot.slane %v605_v1, 6  ;;  %v737_v21 = vadd.f32 %v713_v32, %v661_v34  ;;  %v681_v18 = vmul.f32 %v2432_v36, %v2451_v43 }
 0x109   :  { %v488_v31 = vsel %vm482_vm7, %v486_v56, %v487_v12  ;;  %v2871_v22 = vmul.f32 %v2432_v36, %v2501_v3  ;;  %v558_v55 = vsel %vm552_vm3, %v556_v20, %v557_v40  ;;  %v633_v35 = vrot.slane %v2862_v25, 6 }
 0x10a   :  { %v508_v15 = vadd.f32 %v488_v31, %v444_v30  ;;  %v3309_v32 = vrot.slane %v2620_v38, 1  ;;  %v3310_v26 = vrot.slane %v2458_v45, 1  ;;  %v2883_v6 = vadd.f32 %v2434_v37, %v737_v21 }
 0x10b   :  { %v708_v43 = vrot.slane %v681_v18, 7  ;;  %v709_v36 = vrot.slane %v2871_v22, 7  ;;  %v634_v62 = vsel %vm628_vm4, %v632_v7, %v633_v35  ;;  %v3311_v5 = vrot.slane %v2629_v57, 2  ;;  %v3317_v22 = vld [vmem:[#allocation17_spill] sm:$0xff] }
 0x10c   :  { %v305_v63 = vsel %vm290_vm1, %v3310_v26, %v3309_v32  ;;  %v584_v60 = vadd.f32 %v558_v55, %v508_v15  ;;  %v3312_v14 = vrot.slane %v2462_v46, 2  ;;  %v3313_v1 = vrot.slane %v2633_v51, 3  ;;  %v3318_v15 = vld [vmem:[#allocation7_spill] sm:$0xff]  ;;  %v3319_v26 = vld [vmem:[#allocation8_spill] sm:$0xff] }
 0x10d   :  { %v320_v3 = vadd.f32 %v305_v63, %v2476_v52  ;;  %v3314_v34 = vrot.slane %v2466_v47, 3  ;;  %v2902_v52 = vmul.f32 %v2410_v28, %v2486_v59  ;;  %v781_v20 = vmin.f32 %v2883_v6, 0.0 }
 0x10e   :  { %v369_v45 = vsel %vm354_vm2, %v3312_v14, %v3311_v5  ;;  %v710_v30 = vsel %vm704_vm5, %v708_v43, %v709_v36  ;;  %v660_v21 = vadd.f32 %v634_v62, %v584_v60  ;;  %v3315_v46 = vrot.slane %v2640_v39, 4  ;;  %v3320_v5 = vld [vmem:[#allocation16_spill] sm:$0xff]  ;;  %v3321_v43 = vld [vmem:[#allocation23_spill] sm:$0xff] }
 0x10f   :  { %v433_v56 = vsel %vm418_vm6, %v3314_v34, %v3313_v1  ;;  %v384_v7 = vadd.f32 %v369_v45, %v320_v3  ;;  %v3316_v31 = vrot.slane %v2480_v53, 4  ;;  %v566_v47 = vrot.slane %v2646_v16, 5  ;;  %v3323_v45 = vld [vmem:[#allocation19_spill] sm:$0xff]  ;;  %v3325_v16 = vld [vmem:[#allocation13_spill] sm:$0xff] }
 0x110   :  { %v612_v55 = vmul.f32 %v3318_v15, %v3317_v22  ;;  %v792_v32 = vmul.f32 1.442695, %v781_v20  ;;  %v688_v63 = vmul.f32 %v3319_v26, %v3317_v22  ;;  %v315_v3 = vadd.f32 %v3321_v43, %v3320_v5 }
 0x111   :  { %v497_v18 = vsel %vm482_vm7, %v3316_v31, %v3315_v46  ;;  %v448_v28 = vadd.f32 %v433_v56, %v384_v7  ;;  %v736_v60 = vadd.f32 %v710_v30, %v660_v21  ;;  %v3322_v62 = vrot.slane %v2550_v33, 5  ;;  %v3327_v31 = vld [vmem:[#allocation12_spill] sm:$0xff] }
 0x112   :  { %v642_v14 = vrot.slane %v612_v55, 6  ;;  %v3324_v1 = vrot.slane %v3323_v45, 2  ;;  %v3326_v34 = vrot.slane %v3325_v16, 2  ;;  %1976 = vpow2.f32 %v792_v32  ;;  %v3329_v21 = vld [vmem:[#allocation20_spill] sm:$0xff]  ;;  %v3331_v55 = vld [vmem:[#allocation14_spill] sm:$0xff] }
 0x113   :  { %v567_v53 = vsel %vm552_vm3, %v3322_v62, %v566_v47  ;;  %v512_v56 = vadd.f32 %v497_v18, %v448_v28  ;;  %v718_v20 = vrot.slane %v688_v63, 7  ;;  %v2927_v22 = vadd.f32 %v3327_v31, %v736_v60  ;;  %v3337_v62 = vld [vmem:[#allocation31_spill] sm:$0xff] }
 0x114   :  { %v357_v46 = vsel %vm354_vm2, %v3326_v34, %v3324_v1  ;;  %v3328_v30 = vrot.slane %v2577_v10, 6  ;;  %v3330_v15 = vrot.slane %v3329_v21, 3  ;;  %v3332_v26 = vrot.slane %v3331_v55, 3  ;;  %v3339_v34 = vld [vmem:[#allocation27_spill] sm:$0xff] }
 0x115   :  { %v379_v7 = vadd.f32 %v357_v46, %v315_v3  ;;  %v3333_v43 = vrot.slane %v2674_v17, 4  ;;  %v3334_v32 = vrot.slane %v2670_v61, 4  ;;  %v588_v28 = vadd.f32 %v567_v53, %v512_v56 }
 0x116   :  { %v643_v33 = vsel %vm628_vm4, %v3328_v30, %v642_v14  ;;  %v421_v5 = vsel %vm418_vm6, %v3332_v26, %v3330_v15  ;;  %v3335_v63 = vrot.slane %v2591_v44, 7  ;;  %v3336_v60 = vrot.slane %v2687_v9, 5  ;;  %v3341_v15 = vld [vmem:[#allocation32_spill] sm:$0xff] }
 0x117   :  { %v485_v18 = vsel %vm482_vm7, %v3334_v32, %v3333_v43  ;;  %v443_v10 = vadd.f32 %v421_v5, %v379_v7  ;;  %v3338_v1 = vrot.slane %v3337_v62, 5  ;;  %v3340_v46 = vrot.slane %v2620_v38, 1  ;;  %v3342_v7 = vld [vmem:[#allocation11_spill] sm:$0xff] }
 0x118   :  { %v719_v3 = vsel %vm704_vm5, %v3335_v63, %v718_v20  ;;  %v780_v61 = vmin.f32 %v2927_v22, 0.0  ;;  %v629_v53 = vrot.slane %v3341_v15, 6  ;;  %v630_v44 = vrot.slane %v2902_v52, 6 }
 0x119   :  { %v555_v16 = vsel %vm552_vm3, %v3338_v1, %v3336_v60  ;;  %v323_v30 = vadd.f32 %v3340_v46, %v3339_v34  ;;  %v664_v56 = vadd.f32 %v643_v33, %v588_v28  ;;  %v507_v55 = vadd.f32 %v485_v18, %v443_v10 }
 0x11a   :  { %v680_v26 = vmul.f32 %v2412_v29, %v3342_v7  ;;  %v683_v5 = vmul.f32 %v2412_v29, %v2486_v59  ;;  %v790_v43 = vmul.f32 1.442695, %v780_v61  ;;  %v631_v32 = vsel %vm628_vm4, %v629_v53, %v630_v44  ;;  %v3347_v29 = vld [vmem:[#allocation26_spill] sm:$0xff] }
 0x11b   :  { %v3343_v38 = vrot.slane %v2655_v11, 1  ;;  %v3344_v63 = vrot.slane %v2606_v48, 1  ;;  %v3345_v62 = vrot.slane %v2737_v50, 2  ;;  %v3346_v52 = vrot.slane %v2610_v42, 2 }
 0x11c   :  { %v740_v18 = vadd.f32 %v719_v3, %v664_v56  ;;  %v583_v28 = vadd.f32 %v555_v16, %v507_v55  ;;  %v705_v10 = vrot.slane %v680_v26, 7  ;;  %v706_v1 = vrot.slane %v683_v5, 7  ;;  %v1977_v56 = vpop.eup %1976  ;;  %v3357_v26 = vld [vmem:[#allocation24_spill] sm:$0xff] }
 0x11d   :  { %v303_v60 = vsel %vm290_vm1, %v3344_v63, %v3343_v38  ;;  %v367_v33 = vsel %vm354_vm2, %v3346_v52, %v3345_v62  ;;  %1978 = vpow2.f32 %v790_v43  ;;  %v3348_v34 = vrot.slane %v2746_v27, 3  ;;  %v3360_v43 = vld [vmem:[#allocation25_spill] sm:$0xff]  ;;  %v3362_v63 = vld [vmem:[#allocation28_spill] sm:$0xff] }
 0x11e   :  { %v319_v59 = vadd.f32 %v303_v60, %v3347_v29  ;;  %v3349_v11 = vrot.slane %v2616_v2, 3  ;;  %v3350_v46 = vrot.slane %v2750_v54, 4  ;;  %v2983_v50 = vadd.f32 %v2434_v37, %v740_v18 }
 0x11f   :  { %v659_v3 = vadd.f32 %v631_v32, %v583_v28  ;;  %v707_v16 = vsel %vm704_vm5, %v705_v10, %v706_v1  ;;  %v3351_v61 = vrot.slane %v2760_v13, 5  ;;  %v3352_v15 = vrot.slane %v2768_v58, 6  ;;  %v3367_v28 = vld [vmem:[#allocation21_spill] sm:$0xff] }
 0x120   :  { %v431_v48 = vsel %vm418_vm6, %v3349_v11, %v3348_v34  ;;  %v495_v42 = vsel %vm482_vm7, %v487_v12, %v3350_v46  ;;  %v383_v27 = vadd.f32 %v367_v33, %v319_v59  ;;  %v717_v41 = vsel %vm704_vm5, %v709_v36, %v716_v19 }
 0x121   :  { %v565_v2 = vsel %vm552_vm3, %v557_v40, %v3351_v61  ;;  %v641_v54 = vsel %vm628_vm4, %v633_v35, %v3352_v15  ;;  %v3353_v12 = vrot.slane %v2629_v57, 2  ;;  %vm772_vm9 = vcmp.gt.f32.partialorder %v2883_v6, 0.0  ;;  %v3354_v40 = vld [vmem:[#allocation22_spill] sm:$0xff] }
 0x122   :  { %v784_v13 = vmin.f32 %v2983_v50, 0.0  ;;  %v735_v4 = vadd.f32 %v707_v16, %v659_v3  ;;  %v3355_v55 = vrot.slane %v3354_v40, 5  ;;  %v1721_v25 = vadd.f32 -1.0, %v1977_v56 }
 0x123   :  { %v387_v53 = vadd.f32 %v3353_v12, %v323_v30  ;;  %v447_v7 = vadd.f32 %v431_v48, %v383_v27  ;;  %v3356_v35 = vrot.slane %v2633_v51, 3  ;;  %v3358_v19 = vrot.slane %v3357_v26, 6  ;;  %v3359_v30 = vld [vmem:[#allocation15_spill] sm:$0xff] }
 0x124   :  { %v573_v58 = vsel %vm552_vm3, %v566_v47, %v3355_v55  ;;  %v798_v36 = vmul.f32 1.442695, %v784_v13  ;;  %v3012_v5 = vadd.f32 %v3359_v30, %v735_v4  ;;  %v3361_v32 = vrot.slane %v3360_v43, 7  ;;  %v3364_v47 = vld [vmem:[#allocation18_spill] sm:$0xff]  ;;  %v3379_v13 = vld [vmem:[#allocation33_spill] sm:$0xff] }
 0x125   :  { %v451_v23 = vadd.f32 %v3356_v35, %v387_v53  ;;  %v649_v57 = vsel %vm628_vm4, %v642_v14, %v3358_v19  ;;  %v3363_v60 = vrot.slane %v3362_v63, 1  ;;  %v3365_v62 = vrot.slane %v3364_v47, 1  ;;  %v3382_v55 = vld [vmem:[#allocation9_spill] sm:$0xff]  ;;  %v3384_v35 = vld [vmem:[#allocation34_spill] sm:$0xff] }
 0x126   :  { %v725_v38 = vsel %vm704_vm5, %v718_v20, %v3361_v32  ;;  %v817_v51 = vsel %vm772_vm9, %v2883_v6, %v1721_v25  ;;  %v511_v33 = vadd.f32 %v495_v42, %v447_v7  ;;  %v3366_v18 = vrot.slane %v2640_v39, 4  ;;  %v3368_v20 = vld [vmem:[#allocation29_spill] sm:$0xff]  ;;  %v3372_v39 = vld [vmem:[#allocation30_spill] sm:$0xff] }
 0x127   :  { %v301_v52 = vsel %vm290_vm1, %v3365_v62, %v3363_v60  ;;  %1728 = vmatmul.mubr.msk.f32.vlgmr.msra.gmra.mrb[4].mxu1 %vm902_vm8, %v817_v51  ;;  %1980 = vpow2.f32 %v798_v36  ;;  %v779_v29 = vmin.f32 %v3012_v5, 0.0  ;;  %v3369_v59 = vrot.slane %v3368_v20, 2  ;;  %v1979_v25 = vpop.eup %1978  ;;  %v3388_v36 = vld [vmem:[#allocation35_spill] sm:$0xff] }
 0x128   :  { %v515_v14 = vadd.f32 %v3366_v18, %v451_v23  ;;  %v318_v10 = vadd.f32 %v301_v52, %v3367_v28  ;;  %v3370_v34 = vrot.slane %v3323_v45, 2  ;;  %v3371_v48 = vmov 0.0  }
 0x129   :  { %1065 = vmatprep.mubr.f32.mxu1 %v3371_v48  ;;  %v587_v6 = vadd.f32 %v565_v2, %v511_v33  ;;  %v3373_v3 = vrot.slane %v3372_v39, 3  ;;  %v3374_v16 = vrot.slane %v3329_v21, 3  ;;  %v788_v27 = vmul.f32 1.442695, %v779_v29  ;;  %v3381_v21 = vld [vmem:[#allocation10_spill] sm:$0xff] }
 0x12a   :  { %v365_v11 = vsel %vm354_vm2, %v3370_v34, %v3369_v59  ;;  %v591_v46 = vadd.f32 %v573_v58, %v515_v14  ;;  %v3375_v15 = vrot.slane %v2679_v8, 4  ;;  %v3376_v12 = vrot.slane %v2674_v17, 4 }
 0x12b   :  { %v382_v42 = vadd.f32 %v365_v11, %v318_v10  ;;  %v429_v61 = vsel %vm418_vm6, %v3374_v16, %v3373_v3  ;;  %v3377_v53 = vrot.slane %v2698_v24, 5  ;;  %v3378_v56 = vrot.slane %v2687_v9, 5 }
 0x12c   :  { %v493_v45 = vsel %vm482_vm7, %v3376_v12, %v3375_v15  ;;  %v3380_v4 = vrot.slane %v3379_v13, 6  ;;  %v3383_v58 = vpack.c.bf16 %v3381_v21, %v3382_v55  ;;  %v663_v8 = vadd.f32 %v641_v54, %v587_v6  ;;  %v1117_v13 = vld [vmem:[%s3210_s6 + $0x18] sm:$0xff]  ;;  %v1119_v21 = vld [vmem:[%s3210_s6 + $0x28] sm:$0xff] }
 0x12d   :  { %v563_v2 = vsel %vm552_vm3, %v3378_v56, %v3377_v53  ;;  %v667_v7 = vadd.f32 %v649_v57, %v591_v46  ;;  %v446_v17 = vadd.f32 %v429_v61, %v382_v42  ;;  %v3385_v23 = vrot.slane %v3384_v35, 7 }
 0x12e   :  { %v639_v40 = vsel %vm628_vm4, %v630_v44, %v3380_v4  ;;  %1910 = vmatpush1.bf16.msra.mxu1 %v3383_v58  ;;  %v3386_v26 = vmov 0.0|0.0   ;;  %v1720_v9 = vadd.f32 -1.0, %v1979_v25  ;;  %1982 = vpow2.f32 %v788_v27  ;;  %v3387_v44 = vld [vmem:[#allocation36_spill] sm:$0xff]  ;;  %v1120_v58 = vld [vmem:[%s3210_s6 + $0x30] sm:$0xff] }
 0x12f   :  { %v715_v24 = vsel %vm704_vm5, %v706_v1, %v3385_v23  ;;  %1911 = vmatprep.subr.bf16.mxu1 %v3386_v26  ;;  %v742_v19 = vadd.f32 %v2819_v49, %v2850_v0  ;;  %v741_v43 = vadd.f32 %v3388_v36, %v3387_v44  ;;  %vm771_vm10 = vcmp.gt.f32.partialorder %v2927_v22, 0.0  ;;  %v1121_v25 = vld [vmem:[%s3210_s6 + $0x38] sm:$0xff]  ;;  %v1124_v23 = vld [vmem:[%s3210_s6 + $0x50] sm:$0xff]  ;;  %v1127_v44 = vld [vmem:[%s3210_s6 + $0x68] sm:$0xff] }
 0x130   :  { %v739_v32 = vadd.f32 %v717_v41, %v663_v8  ;;  %v743_v54 = vadd.f32 %v725_v38, %v667_v7  ;;  %v510_v57 = vadd.f32 %v493_v45, %v446_v17  ;;  %v816_v63 = vsel %vm771_vm10, %v2927_v22, %v1720_v9  ;;  %v1122_v7 = vld [vmem:[%s3210_s6 + $0x40] sm:$0xff]  ;;  %v1123_v17 = vld [vmem:[%s3210_s6 + $0x48] sm:$0xff] }
 0x131   :  { %v768_v60 = vadd.f32 %v3327_v31, %v742_v19  ;;  %976 = vmatprep.mubr.f32.mxu0 %v816_v63  ;;  %v767_v49 = vadd.f32 %v3359_v30, %v741_v43  ;;  %v1981_v33 = vpop.eup %1980  ;;  %vm775_vm11 = vcmp.gt.f32.partialorder %v2983_v50, 0.0  ;;  %vm770_vm12 = vcmp.gt.f32.partialorder %v3012_v5, 0.0  ;;  %v1126_v19 = vld [vmem:[%s3210_s6 + $0x60] sm:$0xff]  ;;  %v1128_v43 = vld [vmem:[%s3210_s6 + $0x70] sm:$0xff] }
 0x132   :  { %v765_v1 = vadd.f32 %v3327_v31, %v739_v32  ;;  %v769_v47 = vadd.f32 %v2434_v37, %v743_v54  ;;  %v586_v62 = vadd.f32 %v563_v2, %v510_v57  ;;  %v1724_v41 = vadd.f32 -1.0, %v1981_v33  ;;  %v1116_v2 = vld [vmem:[%s3210_s6 + $0x10] sm:$0xff]  ;;  %v1129_v32 = vld [vmem:[%s3210_s6 + $0x78] sm:$0xff]  ;;  %v1130_v57 = vld [vmem:[%s3210_s6 + $0x80] sm:$0xff] }
 0x133   :  { %v786_v51 = vmin.f32 %v768_v60, 0.0  ;;  %v785_v28 = vmin.f32 %v767_v49, 0.0  ;;  %vm777_vm0 = vcmp.gt.f32.partialorder %v768_v60, 0.0  ;;  %vm776_vm1 = vcmp.gt.f32.partialorder %v767_v49, 0.0 }
 0x134   :  { %v783_v0 = vmin.f32 %v765_v1, 0.0  ;;  %v787_v52 = vmin.f32 %v769_v47, 0.0  ;;  %v662_v18 = vadd.f32 %v639_v40, %v586_v62  ;;  %v820_v10 = vsel %vm775_vm11, %v2983_v50, %v1724_v41  ;;  %v1118_v40 = vld [vmem:[%s3210_s6 + $0x20] sm:$0xff] }
 0x135   :  { %v802_v31 = vmul.f32 1.442695, %v786_v51  ;;  %1729 = vmatmul.mubr.msk.f32.gmra.mrb[6].mxu1 %vm902_vm8, %v820_v10  ;;  %v800_v59 = vmul.f32 1.442695, %v785_v28  ;;  %vm774_vm13 = vcmp.gt.f32.partialorder %v765_v1, 0.0  ;;  %vm778_vm14 = vcmp.gt.f32.partialorder %v769_v47, 0.0 }
 0x136   :  { %v796_v38 = vmul.f32 1.442695, %v783_v0  ;;  %v804_v14 = vmul.f32 1.442695, %v787_v52  ;;  %v738_v22 = vadd.f32 %v715_v24, %v662_v18  ;;  %1071 = vmatprep.mubr.f32.mxu1 %v3371_v48  ;;  %v1912_v4 = vpack.c.bf16 %v1117_v13, %v1116_v2  ;;  %v1125_v24 = vld [vmem:[%s3210_s6 + $0x58] sm:$0xff]  ;;  %v3389_v62 = vld [vmem:[#allocation5_spill] sm:$0xff] }
 0x137   :  { %v1915_v55 = vpack.c.bf16 %v1119_v21, %v1118_v40  ;;  %v1918_v8 = vpack.c.bf16 %v1121_v25, %v1120_v58  ;;  %v1921_v35 = vpack.c.bf16 %v1123_v17, %v1122_v7  ;;  %v1924_v9 = vpack.c.bf16 %v1125_v24, %v1124_v23  ;;  %v3390_v52 = vld [vmem:[#allocation6_spill] sm:$0xff] }
 0x138   :  { %1984 = vpow2.f32 %v796_v38  ;;  %v1983_v37 = vpop.eup %1982  ;;  %v764_v29 = vadd.f32 %v3359_v30, %v738_v22  ;;  %1913 = vmatpush1.bf16.msra.mxu1 %v1912_v4  ;;  %v1927_v36 = vpack.c.bf16 %v1127_v44, %v1126_v19  ;;  %v1930_v54 = vpack.c.bf16 %v1129_v32, %v1128_v43 }
 0x139   :  { %1986 = vpow2.f32 %v804_v14  ;;  %v1719_v20 = vadd.f32 -1.0, %v1983_v37  ;;  %1914 = vmatprep.subr.bf16.mxu1 %v3386_v26  ;;  %vm2040_vm9 = vmmov 0   ;;  %vm1226_vm10 = vcmask 130048  }
 0x13a   :  { %v782_v34 = vmin.f32 %v764_v29, 0.0  ;;  %1988 = vpow2.f32 %v802_v31  ;;  %vm773_vm15 = vcmp.gt.f32.partialorder %v764_v29, 0.0 }
 0x13b   :  { %v815_v11 = vsel %vm770_vm12, %v3012_v5, %v1719_v20  ;;  %1990 = vpow2.f32 %v800_v59 }
 0x13c   :  { %977 = vmatmul.mubr.f32.vlgmr.msra.gmra.mrb[8].mxu0 %v815_v11  ;;  %v794_v50 = vmul.f32 1.442695, %v782_v34  ;;  %1916 = vmatpush1.bf16.msra.mxu1 %v1915_v55 }
 0x13d   :  { %1917 = vmatprep.subr.bf16.mxu1 %v3386_v26 }
 0x13e   :  { %1992 = vpow2.f32 %v794_v50 }
 0x140   :  { %1919 = vmatpush1.bf16.msra.mxu1 %v1918_v8 }
 0x141   :  { %1920 = vmatprep.subr.bf16.mxu1 %v3386_v26 }
 0x142   :  { %v1985_v6 = vpop.eup %1984 }
 0x143   :  { %v1987_v46 = vpop.eup %1986  ;;  %v1723_v42 = vadd.f32 -1.0, %v1985_v6 }
 0x144   :  { %v1727_v39 = vadd.f32 -1.0, %v1987_v46  ;;  %v1989_v3 = vpop.eup %1988  ;;  %1922 = vmatpush1.bf16.msra.mxu1 %v1921_v35 }
 0x145   :  { %v819_v30 = vsel %vm774_vm13, %v765_v1, %v1723_v42  ;;  %v1991_v61 = vpop.eup %1990  ;;  %v1726_v5 = vadd.f32 -1.0, %v1989_v3  ;;  %1923 = vmatprep.subr.bf16.mxu1 %v3386_v26  ;;  %v890_v1 = vld [vmem:[%s3209_s5] sm:$0x3] }
 0x146   :  { %982 = vmatprep.mubr.f32.mxu0 %v819_v30  ;;  %v823_v16 = vsel %vm778_vm14, %v769_v47, %v1727_v39  ;;  %v1725_v45 = vadd.f32 -1.0, %v1991_v61  ;;  %v899_v51 = vrot.slane %v890_v1, %v3390_v52  ;;  %v1219_v42 = vld [vmem:[%s3211_s7] sm:$0xff]  ;;  %v1220_v39 = vld [vmem:[%s3211_s7 + $0x8] sm:$0xff] }
 0x147   :  { %1730 = vmatmul.mubr.msk.f32.gmra.mrb[8].mxu1 %vm902_vm8, %v823_v16  ;;  %v822_v53 = vsel %vm777_vm0, %v768_v60, %v1726_v5 }
 0x148   :  { %v1993_v27 = vpop.eup %1992  ;;  %v821_v56 = vsel %vm776_vm1, %v767_v49, %v1725_v45  ;;  %1925 = vmatpush1.bf16.msra.mxu1 %v1924_v9  ;;  %v895_v49 = vrot.slane %v890_v1, %v3389_v62 }
 0x149   :  { %v1722_v15 = vadd.f32 -1.0, %v1993_v27  ;;  %1926 = vmatprep.subr.bf16.mxu1 %v3386_v26 }
 0x14b   :  { %v818_v12 = vsel %vm773_vm15, %v764_v29, %v1722_v15 }
 0x14c   :  { %983 = vmatmul.mubr.f32.gmra.mrb[10].mxu0 %v818_v12  ;;  %1928 = vmatpush1.bf16.msra.mxu1 %v1927_v36 }
 0x14d   :  { %988 = vmatprep.mubr.f32.mxu0 %v822_v53  ;;  %1929 = vmatprep.subr.bf16.mxu1 %v3386_v26 }
 0x150   :  { %989 = vmatmul.mubr.f32.gmra.mrb[12].mxu0 %v821_v56  ;;  %1931 = vmatpush1.bf16.msra.mxu1 %v1930_v54  ;;  %v3141_v56 = vpack.c.bf16 %v1220_v39, %v1219_v42 }
 0x151   :  { %1172 = vmatprep.subr.mxu1 %v3371_v48 }
 0x154   :  { %1173 = vmatpush1.msra.mxu1 %v1130_v57 }
 0x155   :  { %1932 = vmatprep.subr.bf16.mxu1 %v3386_v26 }
 0x1fa   :  { %v1061_v63 = vpop.f32.mrb[4].mxu1 }
 0x1fb   :  { %v1063_v60 = vpop.f32.mrb[5].mxu1 }
 0x208   :  { %v1067_v47 = vpop.f32.mrb[6].mxu1 }
 0x209   :  { %v1069_v0 = vpop.f32.mrb[7].mxu1 }
 0x20f   :  { %v978_v33 = vpop.f32.mrb[8].mxu0 }
 0x210   :  { %v979_v18 = vadd.f32 %v978_v33, %v895_v49  ;;  %v980_v41 = vpop.f32.mrb[9].mxu0 }
 0x211   :  { %v981_v38 = vadd.f32 %v980_v41, %v899_v51 }
 0x212   :  { %v1062_v14 = vadd.f32 %v1061_v63, %v979_v18  ;;  %v1221_v63 = vld [vmem:[%s3211_s7 + $0x10] sm:$0xff] }
 0x213   :  { %v1064_v28 = vadd.f32 %v1063_v60, %v981_v38  ;;  %v1222_v60 = vld [vmem:[%s3211_s7 + $0x18] sm:$0xff] }
 0x214   :  { %v1084_v22 = vmin.f32 %v1062_v14, 0.0  ;;  %vm1078_vm3 = vcmp.gt.f32.partialorder %v1062_v14, 0.0  ;;  %v1936_v1 = vpack.c.bf16 %v1222_v60, %v1221_v63 }
 0x215   :  { %v1085_v10 = vmin.f32 %v1064_v28, 0.0  ;;  %vm1079_vm2 = vcmp.gt.f32.partialorder %v1064_v28, 0.0 }
 0x216   :  { %v1090_v31 = vmul.f32 1.442695, %v1084_v22 }
 0x217   :  { %v1092_v37 = vmul.f32 1.442695, %v1085_v10 }
 0x218   :  { %1994 = vpow2.f32 %v1090_v31  ;;  %v1225_v31 = vld [vmem:[%s3212_s8] sm:$0x1]  ;;  %s2041_s8 = smov [#allocation2]  }
 0x219   :  { %1996 = vpow2.f32 %v1092_v37  ;;  %s1703_s4 = sshll.u32 %s2041_s8, 4  ;;  %s1704_s4 = int_to_ptr.vmem [resolvable:$true] %s1703_s4 }
 0x21a   :  { %v1073_v29 = vpop.f32.mrb[8].mxu1  ;;  %s2014_s1 = scalar_lea.vmem %s1704_s4, 32  ;;  %p2019_p1 = scmp.lt.s32.totalorder %s1704_s4, %s1704_s4 }
 0x21b   :  { %v1075_v20 = vpop.f32.mrb[9].mxu1  ;;  %p2015_p0 = scmp.ne.s32.totalorder %s1704_s4, %s2014_s1  ;;  %p2020_p2 = scmp.lt.s32.totalorder %s2014_s1, %s2014_s1 }
 0x21d   :  { %p2021_p3 = por %p2020_p2, %p2019_p1 }
 0x21f   :  { %v984_v59 = vpop.f32.mrb[10].mxu0  ;;  %p2022_p4 = pnand %p2021_p3, %p2015_p0 }
 0x220   :  { %v985_v34 = vadd.f32 %v984_v59, %v895_v49  ;;  %v986_v11 = vpop.f32.mrb[11].mxu0 }
 0x221   :  { %v987_v50 = vadd.f32 %v986_v11, %v899_v51 }
 0x222   :  { %v1995_v6 = vpop.eup %1994  ;;  %v1068_v46 = vadd.f32 %v1067_v47, %v985_v34 }
 0x223   :  { %v1997_v30 = vpop.eup %1996  ;;  %v1070_v3 = vadd.f32 %v1069_v0, %v987_v50  ;;  %v990_v16 = vpop.f32.mrb[12].mxu0  ;;  %v1731_v61 = vadd.f32 -1.0, %v1995_v6  ;;  %v1224_v0 = vld [vmem:[%s3211_s7 + $0x28] sm:$0xff] }
 0x224   :  { %v1086_v27 = vmin.f32 %v1068_v46, 0.0  ;;  %v991_v5 = vadd.f32 %v990_v16, %v895_v49  ;;  %v992_v15 = vpop.f32.mrb[13].mxu0  ;;  %v1732_v12 = vadd.f32 -1.0, %v1997_v30  ;;  %vm1080_vm5 = vcmp.gt.f32.partialorder %v1068_v46, 0.0  ;;  %v1223_v49 = vld [vmem:[%s3211_s7 + $0x20] sm:$0xff] }
 0x225   :  { %v1087_v45 = vmin.f32 %v1070_v3, 0.0  ;;  %v993_v53 = vadd.f32 %v992_v15, %v899_v51  ;;  %v1108_v55 = vsel %vm1078_vm3, %v1062_v14, %v1731_v61  ;;  %vm1081_vm4 = vcmp.gt.f32.partialorder %v1070_v3, 0.0 }
 0x226   :  { %v1094_v2 = vmul.f32 1.442695, %v1086_v27  ;;  %v1074_v13 = vadd.f32 %v1073_v29, %v991_v5  ;;  %v1109_v4 = vsel %vm1079_vm2, %v1064_v28, %v1732_v12  ;;  %v1939_v52 = vpack.c.bf16 %v1224_v0, %v1223_v49 }
 0x227   :  { %v1096_v40 = vmul.f32 1.442695, %v1087_v45  ;;  %v1076_v21 = vadd.f32 %v1075_v20, %v993_v53  ;;  %1737 = vmatprep.mubr.msk.f32.mxu1 %vm902_vm8, %v1109_v4 }
 0x228   :  { %1998 = vpow2.f32 %v1094_v2  ;;  %v1088_v58 = vmin.f32 %v1074_v13, 0.0  ;;  %1205 = vmatmul.mubr.f32.vlgmr.msra.gmra.mrb[10].mxu1 %v1108_v55  ;;  %vm1082_vm7 = vcmp.gt.f32.partialorder %v1074_v13, 0.0 }
 0x229   :  { %2000 = vpow2.f32 %v1096_v40  ;;  %v1089_v25 = vmin.f32 %v1076_v21, 0.0  ;;  %1934 = vmatpush3.bf16.msra.mxu1 %v3141_v56  ;;  %vm1083_vm6 = vcmp.gt.f32.partialorder %v1076_v21, 0.0 }
 0x22a   :  { %v1098_v8 = vmul.f32 1.442695, %v1088_v58  ;;  %1935 = vmatprep.subr.bf16.mxu1 %v3386_v26 }
 0x22b   :  { %v1100_v7 = vmul.f32 1.442695, %v1089_v25 }
 0x22c   :  { %2002 = vpow2.f32 %v1098_v8 }
 0x22d   :  { %2004 = vpow2.f32 %v1100_v7 }
 0x232   :  { %v1999_v17 = vpop.eup %1998 }
 0x233   :  { %v2001_v35 = vpop.eup %2000  ;;  %v1733_v23 = vadd.f32 -1.0, %v1999_v17 }
 0x234   :  { %v1734_v24 = vadd.f32 -1.0, %v2001_v35 }
 0x235   :  { %v1110_v36 = vsel %vm1080_vm5, %v1068_v46, %v1733_v23 }
 0x236   :  { %v2003_v9 = vpop.eup %2002  ;;  %v1111_v19 = vsel %vm1081_vm4, %v1070_v3, %v1734_v24 }
 0x237   :  { %v2005_v44 = vpop.eup %2004  ;;  %1738 = vmatprep.mubr.msk.f32.mxu1 %vm902_vm8, %v1111_v19  ;;  %v1735_v43 = vadd.f32 -1.0, %v2003_v9 }
 0x238   :  { %1210 = vmatmul.mubr.f32.gmra.mrb[12].mxu1 %v1110_v36  ;;  %v1736_v32 = vadd.f32 -1.0, %v2005_v44 }
 0x239   :  { %v1112_v57 = vsel %vm1082_vm7, %v1074_v13, %v1735_v43 }
 0x23a   :  { %v1113_v54 = vsel %vm1083_vm6, %v1076_v21, %v1736_v32 }
 0x23b   :  { %1739 = vmatprep.mubr.msk.f32.mxu1 %vm902_vm8, %v1113_v54  ;;  %vm1449_vm8 = vcmask 24576  }
 0x23c   :  { %1215 = vmatmul.mubr.f32.gmra.mrb[14].mxu1 %v1112_v57 }
 0x23d   :  { %1790 = vmatprep.mubr.msk.f32.mxu1 %vm2040_vm9, %v3371_v48 }
 0x2fb   :  { %v1206_v47 = vpop.f32.mrb[10].mxu1 }
 0x2fc   :  { %v1208_v62 = vpop.f32.mrb[11].mxu1  ;;  %1791 = vmatmul.mubr.msk.f32.vlgmr.msra.gmra.mrb[16].mxu1 %vm1226_vm10, %v1206_v47  ;;  %v1301_v51 = vrot.slane %v1206_v47, 1  ;;  %v1375_v33 = vrot.slane %v1206_v47, 2 }
 0x2fd   :  { %1937 = vmatpush3.bf16.msra.mxu1 %v1936_v1  ;;  %1797 = vmatprep.mubr.msk.f32.mxu1 %vm2040_vm9, %v3371_v48 }
 0x2fe   :  { %1938 = vmatprep.subr.bf16.mxu1 %v3386_v26 }
 0x304   :  { %1798 = vmatmul.mubr.msk.f32.vlgmr.msra.gmra.mrb[16].mxu1 %vm1226_vm10, %v1301_v51 }
 0x305   :  { %1940 = vmatpush3.bf16.msra.mxu1 %v1939_v52  ;;  %1804 = vmatprep.mubr.msk.f32.mxu1 %vm2040_vm9, %v3371_v48 }
 0x306   :  { %1941 = vmatprep.subr.bf16.mxu1 %v3386_v26 }
 0x30b   :  { %v1211_v18 = vpop.f32.mrb[12].mxu1 }
 0x30c   :  { %v1213_v41 = vpop.f32.mrb[13].mxu1  ;;  %1805 = vmatmul.mubr.msk.f32.vlgmr.msra.gmra.mrb[16].mxu1 %vm1226_vm10, %v1375_v33  ;;  %v1463_v38 = vrot.slane %v1211_v18, 2  ;;  %v1537_v22 = vrot.slane %v1211_v18, 3  ;;  %v1611_v10 = vrot.slane %v1211_v18, 4 }
 0x30d   :  { %1943 = vmatpush3.bf16.msra.mxu1 %v3141_v56  ;;  %1811 = vmatprep.mubr.msk.f32.mxu1 %vm2040_vm9, %v3371_v48 }
 0x30e   :  { %1944 = vmatprep.subr.bf16.mxu1 %v3386_v26 }
 0x30f   :  { %v1216_v14 = vpop.f32.mrb[14].mxu1 }
 0x310   :  { %v1217_v28 = vpop.f32.mrb[15].mxu1  ;;  %1812 = vmatmul.mubr.msk.f32.vlgmr.msra.gmra.mrb[18].mxu1 %vm1226_vm10, %v1463_v38 }
 0x311   :  { %1946 = vmatpush3.bf16.msra.mxu1 %v1936_v1  ;;  %1818 = vmatprep.mubr.msk.f32.mxu1 %vm2040_vm9, %v3371_v48 }
 0x312   :  { %1947 = vmatprep.subr.bf16.mxu1 %v3386_v26 }
 0x318   :  { %1819 = vmatmul.mubr.msk.f32.vlgmr.msra.gmra.mrb[18].mxu1 %vm1226_vm10, %v1537_v22 }
 0x319   :  { %1949 = vmatpush3.bf16.msra.mxu1 %v1939_v52  ;;  %1825 = vmatprep.mubr.msk.f32.mxu1 %vm2040_vm9, %v3371_v48 }
 0x320   :  { %1826 = vmatmul.mubr.msk.f32.vlgmr.msra.gmra.mrb[18].mxu1 %vm1226_vm10, %v1611_v10 }
 0x3df   :  { %v1444_v37 = vpop.f32.mrb[16].mxu1 }
 0x3e0   :  { %v1962_v29 = vadd.f32 %v1444_v37, %v1225_v31  ;;  %v1806_v20 = vpop.f32.mrb[17].mxu1 }
 0x3e2   :  { %v1450_v26 = vsel %vm1449_vm8, %v1962_v29, -inf }
 0x3e3   :  { %1451 = vmax.xlane.f32.xlu0 %v1450_v26 }
 0x3f3   :  { %v1680_v59 = vpop.f32.mrb[18].mxu1 }
 0x3f4   :  { %v1963_v34 = vadd.f32 %v1680_v59, %v1225_v31  ;;  %v1827_v11 = vpop.f32.mrb[19].mxu1 }
 0x3f6   :  { %v1685_v50 = vsel %vm1449_vm8, %v1963_v34, -inf }
 0x3f7   :  { %1686 = vmax.xlane.f32.xlu0 %v1685_v50 }
 0x470   :  { %v1452_v48 = vpop.xlane.xlu0 %1451 }
 0x471   :  { %v1453_v6 = vsub.f32 %v1962_v29, %v1452_v48 }
 0x473   :  { %v1454_v46 = vmul.f32 1.442695, %v1453_v6 }
 0x475   :  { %2006 = vpow2.f32 %v1454_v46 }
 0x47f   :  { %v2007_v42 = vpop.eup %2006 }
 0x480   :  { %v1456_v39 = vsel %vm1449_vm8, %v2007_v42, 0.0 }
 0x481   :  { %1457 = vadd.xlane.f32.xlu1 %v1456_v39 }
 0x484   :  { %v1687_v30 = vpop.xlane.xlu0 %1686 }
 0x485   :  { %v1688_v3 = vsub.f32 %v1963_v34, %v1687_v30 }
 0x487   :  { %v1689_v16 = vmul.f32 1.442695, %v1688_v3 }
 0x489   :  { %2008 = vpow2.f32 %v1689_v16 }
 0x493   :  { %v2009_v61 = vpop.eup %2008 }
 0x494   :  { %v1691_v27 = vsel %vm1449_vm8, %v2009_v61, 0.0 }
 0x495   :  { %1692 = vadd.xlane.f32.xlu1 %v1691_v27 }
 0x50e   :  { %v1458_v5 = vpop.xlane.xlu1 %1457 }
 0x50f   :  { %2010 = vrcp.f32 %v1458_v5 }
 0x519   :  { %v2011_v15 = vpop.eup %2010 }
 0x51a   :  { %v1460_v12 = vmul.f32 %v2011_v15, %v2007_v42 }
 0x51c   :  { %1461 = vst.msk [vmem:[#allocation2] sm:$0x1] %vm1449_vm8, %v1460_v12 }
 0x522   :  { %v1693_v45 = vpop.xlane.xlu1 %1692 }
 0x523   :  { %2012 = vrcp.f32 %v1693_v45 }
 0x52d   :  { %v2013_v53 = vpop.eup %2012 }
 0x52e   :  { %v1695_v56 = vmul.f32 %v2013_v53, %v2009_v61 }
 0x530   :  { %1696 = vst.msk [vmem:[#allocation2 + $0x1] sm:$0x1] %vm1449_vm8, %v1695_v56 }
 0x531   :  { %2025 = shalt.err (!%p2022_p4)
}
 0x532   :  { %s2026_s19 = scalar_lea.hbm %s3213_s9, 32 }
 0x533   :  { %p2027_p5 = scmp.ne.s32.totalorder %s3213_s9, %s2026_s19  ;;  %p2030_p6 = scmp.lt.u32.totalorder %s2026_s19, %s3213_s9 }
 0x535   :  { %p2032_p7 = pnand %p2030_p6, %p2027_p5 }
 0x537   :  { %2035 = shalt.err (!%p2032_p7)
}
 0x538   :  { %1706 = dma.vmem_to_hbm [thread:$0]  %s1704_s4, 32, %s3213_s9, [#allocation3]  }
 0x539   :  { %2036 = dma.done.wait [#allocation3], 32  }
 0x53a   :  { %2037 = vsyncadd [#allocation3], 4294967264 }
 0x53b   :  { %1710 = vsyncpa [#allocation3], 1 }

</bundles_post_ra>
